<compile_context>
chip_gen: v5e
topology: v5e:2x2
jax: 0.10.0
libtpu: 0.0.40
codegen_flags: <defaults>
</compile_context>

<pallas_src>
import functools

import jax
import jax.numpy as jnp
from jax.experimental import pallas as pl
from jax.experimental.pallas import tpu as pltpu


def _round_up(n, m):
    return (n + m - 1) // m * m


# --------------------------------------------------------------------------
# Kernel
# --------------------------------------------------------------------------
def qstar_kernel(n_layers, hidden, mm_dtype, *refs):
    """Fused encoder (Linear -> LayerNorm -> ReLU, n_layers times) + fused heads.

    Padded lanes (>= hidden) of every activation are identically zero:
    zero-padded W columns / biases make z exactly 0 there, and gamma = beta = 0
    keep them 0 after the affine, so the unmasked sums below reduce over
    exactly the `hidden` real lanes.
    """
    if n_layers > 1:
        x_ref, w0_ref, wrest_ref, vecs_ref, wheads_ref, bheads_ref, out_ref = refs
    else:
        x_ref, w0_ref, vecs_ref, wheads_ref, bheads_ref, out_ref = refs
        wrest_ref = None

    inv_h = 1.0 / float(hidden)
    h = x_ref[...]                                    # (bt, state) f32

    # Unrolled: n_layers is small here.  TODO(synk): lax.fori_loop + streamed
    # w_rest (layer grid axis) for deep n_layers / large hidden.
    for l in range(n_layers):
        w = w0_ref[...] if l == 0 else wrest_ref[l - 1]
        b = vecs_ref[3 * l + 0:3 * l + 1, :]          # (1, h_pad) ref-slice views
        gamma = vecs_ref[3 * l + 1:3 * l + 2, :]
        beta = vecs_ref[3 * l + 2:3 * l + 3, :]

        # Linear (MXU, f32 accumulate) -> LayerNorm (VPU/XLU, rsqrt on EUP) -> ReLU
        z = jnp.dot(h.astype(mm_dtype), w, preferred_element_type=jnp.float32) + b
        mean = jnp.sum(z, axis=-1, keepdims=True) * inv_h
        var = jnp.sum(z * z, axis=-1, keepdims=True) * inv_h - mean * mean
        zn = (z - mean) * jax.lax.rsqrt(var + 1e-5) * gamma + beta
        h = jnp.maximum(zn, 0.0)

    # Fused policy|value head: one MXU matmul, lane-dense full-width store.
    out_ref[...] = (
        jnp.dot(h.astype(mm_dtype), wheads_ref[...],
                preferred_element_type=jnp.float32)
        + bheads_ref[...]
    )


# --------------------------------------------------------------------------
# Parameter packing (lane-dense padding, fused heads, 2-D bias/LN pack)
# --------------------------------------------------------------------------
def pack_params(raw, state_size, hidden, n_layers, *, mm_dtype=jnp.float32):
    """Pack parameters:
      w0      (state_size, h_pad)          first Linear (K is NOT padded)
      w_rest  (n_layers-1, h_pad, h_pad)   remaining Linears (only if n_layers > 1)
      vecs    (3*n_layers, h_pad) f32      rows [3l,3l+1,3l+2] = bias, gamma, beta
      w_heads (h_pad, n_out_pad)           cols [0:hidden]=policy, [hidden]=value
      b_heads (1, n_out_pad) f32
    """
    h_pad = _round_up(hidden, 128)
    n_out_pad = _round_up(hidden + 1, 128)

    w0, _, _, _ = raw["layers"][0]
    w0_p = (jnp.zeros((state_size, h_pad), mm_dtype)
            .at[:, :hidden].set(w0.astype(mm_dtype)))

    w_rest = None
    if n_layers > 1:
        ws = []
        for l in range(1, n_layers):
            w, _, _, _ = raw["layers"][l]
            ws.append(jnp.zeros((h_pad, h_pad), mm_dtype)
                      .at[:hidden, :hidden].set(w.astype(mm_dtype)))
        w_rest = jnp.stack(ws, axis=0)

    vecs = jnp.zeros((3 * n_layers, h_pad), jnp.float32)
    for l in range(n_layers):
        _, b, g, bt = raw["layers"][l]
        vecs = vecs.at[3 * l + 0, :hidden].set(b)
        vecs = vecs.at[3 * l + 1, :hidden].set(g)
        vecs = vecs.at[3 * l + 2, :hidden].set(bt)

    w_heads = jnp.zeros((h_pad, n_out_pad), mm_dtype)
    w_heads = w_heads.at[:hidden, :hidden].set(raw["w_p"].astype(mm_dtype))
    w_heads = w_heads.at[:hidden, hidden].set(raw["w_v"][:, 0].astype(mm_dtype))
    b_heads = jnp.zeros((1, n_out_pad), jnp.float32)
    b_heads = b_heads.at[0, :hidden].set(raw["b_p"])
    b_heads = b_heads.at[0, hidden].set(raw["b_v"][0])

    return dict(w0=w0_p, w_rest=w_rest, vecs=vecs, w_heads=w_heads,
                b_heads=b_heads, h_pad=h_pad, n_out_pad=n_out_pad,
                mm_dtype=mm_dtype)


# --------------------------------------------------------------------------
# Wrapper
# --------------------------------------------------------------------------
def _default_batch_tile(B):
    # Small batches: one grid step (the ~0.35us per-step overhead dominates).
    if B <= 512:
        return B
    # Large batches: biggest tile <= 512 (multiple of 8) dividing B, so
    # B/tile >= 2 and both v7x TensorCores get work on the "parallel" axis.
    for t in (512, 384, 256, 128, 64, 32, 16, 8):
        if B % t == 0:
            return t
    return B


def qstar_forward(x, packed, *, state_size, hidden_size, n_layers,
                  batch_tile=None):
    B = x.shape[0]
    if batch_tile is None:
        batch_tile = _default_batch_tile(B)
    assert B % batch_tile == 0, "batch_tile must divide batch"
    assert batch_tile % 8 == 0 or batch_tile == B, \
        "batch_tile must be a multiple of 8 (f32 sublane) or the full batch"

    n_out_pad = packed["n_out_pad"]
    mm_dtype = packed["mm_dtype"]

    x = x.astype(jnp.float32)          # no lane padding: first matmul K = state_size
    grid = (B // batch_tile,)

    has_rest = n_layers > 1
    args = [x, packed["w0"]]
    if has_rest:
        args.append(packed["w_rest"])
    args += [packed["vecs"], packed["w_heads"], packed["b_heads"]]

    param_bytes = sum(int(a.size) * a.dtype.itemsize for a in args[1:])
    io_bytes = 2 * 2 * batch_tile * (state_size + n_out_pad) * 4   # dbl-buffered x/out tiles
    flops = 2 * B * (state_size * hidden_size
                     + (n_layers - 1) * hidden_size * hidden_size
                     + hidden_size * (hidden_size + 1))
    cost = pl.CostEstimate(
        flops=int(flops),
        transcendentals=int(B * n_layers),               # one rsqrt per row per LayerNorm
        bytes_accessed=int(param_bytes + x.size * 4 + B * n_out_pad * 4),
    )
    vmem_limit = None
    if param_bytes + io_bytes > 30 * 1024 * 1024:         # above the 32 MiB scoped default
        vmem_limit = min(100 * 1024 * 1024, (param_bytes + io_bytes) * 5 // 4)

    kernel = functools.partial(qstar_kernel, n_layers, hidden_size, mm_dtype)
    out_shape = jax.ShapeDtypeStruct((B, n_out_pad), jnp.float32)

    def build(single_buffer_params):
        def const_spec(shape):
            idx = (lambda i: (0, 0)) if len(shape) == 2 else (lambda i: (0, 0, 0))
            if single_buffer_params:
                # Constant index_map: double-buffering buys no overlap, only 2x VMEM.
                return pl.BlockSpec(shape, idx, pipeline_mode=pl.Buffered(1))
            return pl.BlockSpec(shape, idx)

        in_specs = [pl.BlockSpec((batch_tile, state_size), lambda i: (i, 0)),
                    const_spec(packed["w0"].shape)]
        if has_rest:
            in_specs.append(const_spec(packed["w_rest"].shape))
        in_specs += [const_spec(packed["vecs"].shape),
                     const_spec(packed["w_heads"].shape),
                     const_spec(packed["b_heads"].shape)]
        out_spec = pl.BlockSpec((batch_tile, n_out_pad), lambda i: (i, 0))

        return pl.pallas_call(
            kernel,
            grid_spec=pltpu.PrefetchScalarGridSpec(
                num_scalar_prefetch=0,
                grid=grid,
                in_specs=in_specs,
                out_specs=out_spec,
            ),
            out_shape=out_shape,
            cost_estimate=cost,
            compiler_params=pltpu.CompilerParams(
                dimension_semantics=("parallel",),
                vmem_limit_bytes=vmem_limit,
            ),
        )

    try:
        heads = jax.block_until_ready(build(single_buffer_params=True)(*args))
    except Exception:
        # This JAX build rejected pl.Buffered(1) on pallas_call BlockSpecs;
        # fall back to default (double-buffered) parameter specs.  Any unrelated
        # error will re-surface identically from this fallback call.
        heads = jax.block_until_ready(build(single_buffer_params=False)(*args))

    policy = heads[:, :hidden_size]
    value = heads[:, hidden_size:hidden_size + 1]
    return policy, value


# --------------------------------------------------------------------------
# Synthetic params + pure-JAX reference
# --------------------------------------------------------------------------
def init_params(key, state_size, hidden_size, n_layers):
    layers = []
    in_dim = state_size
    for _ in range(n_layers):
        key, kw, kb = jax.random.split(key, 3)
        w = jax.random.normal(kw, (in_dim, hidden_size), jnp.float32) * 0.05
        b = jax.random.normal(kb, (hidden_size,), jnp.float32) * 0.01
        g = jnp.ones((hidden_size,), jnp.float32)     # nn.LayerNorm weight init
        bt = jnp.zeros((hidden_size,), jnp.float32)   # nn.LayerNorm bias init
        layers.append((w, b, g, bt))
        in_dim = hidden_size
    key, kw, kb = jax.random.split(key, 3)
    w_v = jax.random.normal(kw, (hidden_size, 1), jnp.float32) * 0.05
    b_v = jax.random.normal(kb, (1,), jnp.float32) * 0.01
    key, kw, kb = jax.random.split(key, 3)
    w_p = jax.random.normal(kw, (hidden_size, hidden_size), jnp.float32) * 0.05
    b_p = jax.random.normal(kb, (hidden_size,), jnp.float32) * 0.01
    return dict(layers=layers, w_v=w_v, b_v=b_v, w_p=w_p, b_p=b_p)


def reference_forward(x, raw, n_layers):
    h = x
    for l in range(n_layers):
        w, b, g, bt = raw["layers"][l]
        h = h @ w + b
        mean = jnp.mean(h, axis=-1, keepdims=True)
        var = jnp.mean((h - mean) ** 2, axis=-1, keepdims=True)
        h = (h - mean) * jax.lax.rsqrt(var + 1e-5) * g + bt
        h = jnp.maximum(h, 0.0)
    policy = h @ raw["w_p"] + raw["b_p"]
    value = h @ raw["w_v"] + raw["b_v"]
    return policy, value


if __name__ == "__main__":
    STATE_SIZE = 32
    HIDDEN = 64
    N_LAYERS = 4
    BATCH = 16          # small batch -> default tiling runs a single grid step

    key = jax.random.PRNGKey(0)
    key, kx = jax.random.split(key)
    x = jax.random.normal(kx, (BATCH, STATE_SIZE), jnp.float32)
    raw = init_params(key, STATE_SIZE, HIDDEN, N_LAYERS)

    # fp32 matmul path keeps parity with the f32 reference; pass
    # mm_dtype=jnp.bfloat16 for ~3x MXU throughput / half the weight DMA.
    packed = pack_params(raw, STATE_SIZE, HIDDEN, N_LAYERS, mm_dtype=jnp.float32)

    policy, value = qstar_forward(
        x, packed,
        state_size=STATE_SIZE, hidden_size=HIDDEN, n_layers=N_LAYERS,
    )
    policy = jax.block_until_ready(policy)
    value = jax.block_until_ready(value)

    ref_policy, ref_value = reference_forward(x, raw, N_LAYERS)
    assert policy.shape == (BATCH, HIDDEN)
    assert value.shape == (BATCH, 1)
    assert jnp.allclose(policy, ref_policy, atol=1e-4, rtol=1e-4)
    assert jnp.allclose(value, ref_value, atol=1e-4, rtol=1e-4)

    print("KERNEL_OK")
</pallas_src>

<mosaic_0001>
module attributes {stable_mosaic.version = 11 : i64} {
  func.func @qstar_kernel(%arg0: i32, %arg1: memref<16x32xf32, #tpu.memory_space<vmem>>, %arg2: memref<32x128xf32, #tpu.memory_space<vmem>>, %arg3: memref<3x128x128xf32, #tpu.memory_space<vmem>>, %arg4: memref<12x128xf32, #tpu.memory_space<vmem>>, %arg5: memref<128x128xf32, #tpu.memory_space<vmem>>, %arg6: memref<1x128xf32, #tpu.memory_space<vmem>>, %arg7: memref<16x128xf32, #tpu.memory_space<vmem>>) attributes {dimension_semantics = [#tpu.dimension_semantics<parallel>], iteration_bounds = array<i64: 1>, scalar_prefetch = 0 : i64, scratch_operands = 0 : i64, tpu.core_type = #tpu.core_type<tc>, window_params = [{transform_indices = @transform_0, window_bounds = array<i64: 16, 32>}, {pipeline_mode = #tpu.pipeline_mode<synchronous>, transform_indices = @transform_1, window_bounds = array<i64: 32, 128>}, {pipeline_mode = #tpu.pipeline_mode<synchronous>, transform_indices = @transform_2, window_bounds = array<i64: 3, 128, 128>}, {pipeline_mode = #tpu.pipeline_mode<synchronous>, transform_indices = @transform_3, window_bounds = array<i64: 12, 128>}, {pipeline_mode = #tpu.pipeline_mode<synchronous>, transform_indices = @transform_4, window_bounds = array<i64: 128, 128>}, {pipeline_mode = #tpu.pipeline_mode<synchronous>, transform_indices = @transform_5, window_bounds = array<i64: 1, 128>}, {transform_indices = @transform_6, window_bounds = array<i64: 16, 128>}]} {
    %c0 = arith.constant 0 : index
    %c0_0 = arith.constant 0 : index
    %0 = vector.load %arg1[%c0, %c0_0] : memref<16x32xf32, #tpu.memory_space<vmem>>, vector<16x32xf32>
    %c0_1 = arith.constant 0 : index
    %c0_2 = arith.constant 0 : index
    %1 = vector.load %arg2[%c0_1, %c0_2] : memref<32x128xf32, #tpu.memory_space<vmem>>, vector<32x128xf32>
    %c0_3 = arith.constant 0 : index
    %c0_4 = arith.constant 0 : index
    %2 = vector.load %arg4[%c0_3, %c0_4] : memref<12x128xf32, #tpu.memory_space<vmem>>, vector<1x128xf32>
    %c1 = arith.constant 1 : index
    %c0_5 = arith.constant 0 : index
    %3 = vector.load %arg4[%c1, %c0_5] : memref<12x128xf32, #tpu.memory_space<vmem>>, vector<1x128xf32>
    %c2 = arith.constant 2 : index
    %c0_6 = arith.constant 0 : index
    %4 = vector.load %arg4[%c2, %c0_6] : memref<12x128xf32, #tpu.memory_space<vmem>>, vector<1x128xf32>
    %cst = arith.constant dense<0.000000e+00> : vector<16x128xf32>
    %5 = tpu.matmul %0, %1, %cst {dimension_numbers = #tpu.dot_dimension_numbers<[1], [0], [0], [1], [0, 0, 1, 1], [], []>} : vector<16x32xf32>, vector<32x128xf32>, vector<16x128xf32> -> vector<16x128xf32>
    %6 = vector.broadcast %2 : vector<1x128xf32> to vector<16x128xf32>
    %7 = arith.addf %5, %6 : vector<16x128xf32>
    %cst_7 = arith.constant dense<0.000000e+00> : vector<16xf32>
    %8 = vector.multi_reduction <add>, %7, %cst_7 [1] : vector<16x128xf32> to vector<16xf32>
    %9 = vector.shape_cast %8 : vector<16xf32> to vector<16x1xf32>
    %cst_8 = arith.constant 1.562500e-02 : f32
    %10 = vector.broadcast %cst_8 : f32 to vector<16x1xf32>
    %11 = arith.mulf %9, %10 : vector<16x1xf32>
    %12 = arith.mulf %7, %7 : vector<16x128xf32>
    %cst_9 = arith.constant dense<0.000000e+00> : vector<16xf32>
    %13 = vector.multi_reduction <add>, %12, %cst_9 [1] : vector<16x128xf32> to vector<16xf32>
    %14 = vector.shape_cast %13 : vector<16xf32> to vector<16x1xf32>
    %cst_10 = arith.constant 1.562500e-02 : f32
    %15 = vector.broadcast %cst_10 : f32 to vector<16x1xf32>
    %16 = arith.mulf %14, %15 : vector<16x1xf32>
    %17 = arith.mulf %11, %11 : vector<16x1xf32>
    %18 = arith.subf %16, %17 : vector<16x1xf32>
    %19 = vector.broadcast %11 : vector<16x1xf32> to vector<16x128xf32>
    %20 = arith.subf %7, %19 : vector<16x128xf32>
    %cst_11 = arith.constant 9.99999974E-6 : f32
    %21 = vector.broadcast %cst_11 : f32 to vector<16x1xf32>
    %22 = arith.addf %18, %21 : vector<16x1xf32>
    %23 = math.rsqrt %22 : vector<16x1xf32>
    %24 = vector.broadcast %23 : vector<16x1xf32> to vector<16x128xf32>
    %25 = arith.mulf %20, %24 : vector<16x128xf32>
    %26 = vector.broadcast %3 : vector<1x128xf32> to vector<16x128xf32>
    %27 = arith.mulf %25, %26 : vector<16x128xf32>
    %28 = vector.broadcast %4 : vector<1x128xf32> to vector<16x128xf32>
    %29 = arith.addf %27, %28 : vector<16x128xf32>
    %cst_12 = arith.constant 0.000000e+00 : f32
    %30 = vector.broadcast %cst_12 : f32 to vector<16x128xf32>
    %31 = arith.maximumf %29, %30 : vector<16x128xf32>
    %c0_13 = arith.constant 0 : index
    %c0_14 = arith.constant 0 : index
    %c0_15 = arith.constant 0 : index
    %32 = vector.load %arg3[%c0_13, %c0_14, %c0_15] : memref<3x128x128xf32, #tpu.memory_space<vmem>>, vector<1x128x128xf32>
    %33 = vector.shape_cast %32 : vector<1x128x128xf32> to vector<128x128xf32>
    %c3 = arith.constant 3 : index
    %c0_16 = arith.constant 0 : index
    %34 = vector.load %arg4[%c3, %c0_16] : memref<12x128xf32, #tpu.memory_space<vmem>>, vector<1x128xf32>
    %c4 = arith.constant 4 : index
    %c0_17 = arith.constant 0 : index
    %35 = vector.load %arg4[%c4, %c0_17] : memref<12x128xf32, #tpu.memory_space<vmem>>, vector<1x128xf32>
    %c5 = arith.constant 5 : index
    %c0_18 = arith.constant 0 : index
    %36 = vector.load %arg4[%c5, %c0_18] : memref<12x128xf32, #tpu.memory_space<vmem>>, vector<1x128xf32>
    %cst_19 = arith.constant dense<0.000000e+00> : vector<16x128xf32>
    %37 = tpu.matmul %31, %33, %cst_19 {dimension_numbers = #tpu.dot_dimension_numbers<[1], [0], [0], [1], [0, 0, 1, 1], [], []>} : vector<16x128xf32>, vector<128x128xf32>, vector<16x128xf32> -> vector<16x128xf32>
    %38 = vector.broadcast %34 : vector<1x128xf32> to vector<16x128xf32>
    %39 = arith.addf %37, %38 : vector<16x128xf32>
    %cst_20 = arith.constant dense<0.000000e+00> : vector<16xf32>
    %40 = vector.multi_reduction <add>, %39, %cst_20 [1] : vector<16x128xf32> to vector<16xf32>
    %41 = vector.shape_cast %40 : vector<16xf32> to vector<16x1xf32>
    %cst_21 = arith.constant 1.562500e-02 : f32
    %42 = vector.broadcast %cst_21 : f32 to vector<16x1xf32>
    %43 = arith.mulf %41, %42 : vector<16x1xf32>
    %44 = arith.mulf %39, %39 : vector<16x128xf32>
    %cst_22 = arith.constant dense<0.000000e+00> : vector<16xf32>
    %45 = vector.multi_reduction <add>, %44, %cst_22 [1] : vector<16x128xf32> to vector<16xf32>
    %46 = vector.shape_cast %45 : vector<16xf32> to vector<16x1xf32>
    %cst_23 = arith.constant 1.562500e-02 : f32
    %47 = vector.broadcast %cst_23 : f32 to vector<16x1xf32>
    %48 = arith.mulf %46, %47 : vector<16x1xf32>
    %49 = arith.mulf %43, %43 : vector<16x1xf32>
    %50 = arith.subf %48, %49 : vector<16x1xf32>
    %51 = vector.broadcast %43 : vector<16x1xf32> to vector<16x128xf32>
    %52 = arith.subf %39, %51 : vector<16x128xf32>
    %cst_24 = arith.constant 9.99999974E-6 : f32
    %53 = vector.broadcast %cst_24 : f32 to vector<16x1xf32>
    %54 = arith.addf %50, %53 : vector<16x1xf32>
    %55 = math.rsqrt %54 : vector<16x1xf32>
    %56 = vector.broadcast %55 : vector<16x1xf32> to vector<16x128xf32>
    %57 = arith.mulf %52, %56 : vector<16x128xf32>
    %58 = vector.broadcast %35 : vector<1x128xf32> to vector<16x128xf32>
    %59 = arith.mulf %57, %58 : vector<16x128xf32>
    %60 = vector.broadcast %36 : vector<1x128xf32> to vector<16x128xf32>
    %61 = arith.addf %59, %60 : vector<16x128xf32>
    %cst_25 = arith.constant 0.000000e+00 : f32
    %62 = vector.broadcast %cst_25 : f32 to vector<16x128xf32>
    %63 = arith.maximumf %61, %62 : vector<16x128xf32>
    %c1_26 = arith.constant 1 : index
    %c0_27 = arith.constant 0 : index
    %c0_28 = arith.constant 0 : index
    %64 = vector.load %arg3[%c1_26, %c0_27, %c0_28] : memref<3x128x128xf32, #tpu.memory_space<vmem>>, vector<1x128x128xf32>
    %65 = vector.shape_cast %64 : vector<1x128x128xf32> to vector<128x128xf32>
    %c6 = arith.constant 6 : index
    %c0_29 = arith.constant 0 : index
    %66 = vector.load %arg4[%c6, %c0_29] : memref<12x128xf32, #tpu.memory_space<vmem>>, vector<1x128xf32>
    %c7 = arith.constant 7 : index
    %c0_30 = arith.constant 0 : index
    %67 = vector.load %arg4[%c7, %c0_30] : memref<12x128xf32, #tpu.memory_space<vmem>>, vector<1x128xf32>
    %c8 = arith.constant 8 : index
    %c0_31 = arith.constant 0 : index
    %68 = vector.load %arg4[%c8, %c0_31] : memref<12x128xf32, #tpu.memory_space<vmem>>, vector<1x128xf32>
    %cst_32 = arith.constant dense<0.000000e+00> : vector<16x128xf32>
    %69 = tpu.matmul %63, %65, %cst_32 {dimension_numbers = #tpu.dot_dimension_numbers<[1], [0], [0], [1], [0, 0, 1, 1], [], []>} : vector<16x128xf32>, vector<128x128xf32>, vector<16x128xf32> -> vector<16x128xf32>
    %70 = vector.broadcast %66 : vector<1x128xf32> to vector<16x128xf32>
    %71 = arith.addf %69, %70 : vector<16x128xf32>
    %cst_33 = arith.constant dense<0.000000e+00> : vector<16xf32>
    %72 = vector.multi_reduction <add>, %71, %cst_33 [1] : vector<16x128xf32> to vector<16xf32>
    %73 = vector.shape_cast %72 : vector<16xf32> to vector<16x1xf32>
    %cst_34 = arith.constant 1.562500e-02 : f32
    %74 = vector.broadcast %cst_34 : f32 to vector<16x1xf32>
    %75 = arith.mulf %73, %74 : vector<16x1xf32>
    %76 = arith.mulf %71, %71 : vector<16x128xf32>
    %cst_35 = arith.constant dense<0.000000e+00> : vector<16xf32>
    %77 = vector.multi_reduction <add>, %76, %cst_35 [1] : vector<16x128xf32> to vector<16xf32>
    %78 = vector.shape_cast %77 : vector<16xf32> to vector<16x1xf32>
    %cst_36 = arith.constant 1.562500e-02 : f32
    %79 = vector.broadcast %cst_36 : f32 to vector<16x1xf32>
    %80 = arith.mulf %78, %79 : vector<16x1xf32>
    %81 = arith.mulf %75, %75 : vector<16x1xf32>
    %82 = arith.subf %80, %81 : vector<16x1xf32>
    %83 = vector.broadcast %75 : vector<16x1xf32> to vector<16x128xf32>
    %84 = arith.subf %71, %83 : vector<16x128xf32>
    %cst_37 = arith.constant 9.99999974E-6 : f32
    %85 = vector.broadcast %cst_37 : f32 to vector<16x1xf32>
    %86 = arith.addf %82, %85 : vector<16x1xf32>
    %87 = math.rsqrt %86 : vector<16x1xf32>
    %88 = vector.broadcast %87 : vector<16x1xf32> to vector<16x128xf32>
    %89 = arith.mulf %84, %88 : vector<16x128xf32>
    %90 = vector.broadcast %67 : vector<1x128xf32> to vector<16x128xf32>
    %91 = arith.mulf %89, %90 : vector<16x128xf32>
    %92 = vector.broadcast %68 : vector<1x128xf32> to vector<16x128xf32>
    %93 = arith.addf %91, %92 : vector<16x128xf32>
    %cst_38 = arith.constant 0.000000e+00 : f32
    %94 = vector.broadcast %cst_38 : f32 to vector<16x128xf32>
    %95 = arith.maximumf %93, %94 : vector<16x128xf32>
    %c2_39 = arith.constant 2 : index
    %c0_40 = arith.constant 0 : index
    %c0_41 = arith.constant 0 : index
    %96 = vector.load %arg3[%c2_39, %c0_40, %c0_41] : memref<3x128x128xf32, #tpu.memory_space<vmem>>, vector<1x128x128xf32>
    %97 = vector.shape_cast %96 : vector<1x128x128xf32> to vector<128x128xf32>
    %c9 = arith.constant 9 : index
    %c0_42 = arith.constant 0 : index
    %98 = vector.load %arg4[%c9, %c0_42] : memref<12x128xf32, #tpu.memory_space<vmem>>, vector<1x128xf32>
    %c10 = arith.constant 10 : index
    %c0_43 = arith.constant 0 : index
    %99 = vector.load %arg4[%c10, %c0_43] : memref<12x128xf32, #tpu.memory_space<vmem>>, vector<1x128xf32>
    %c11 = arith.constant 11 : index
    %c0_44 = arith.constant 0 : index
    %100 = vector.load %arg4[%c11, %c0_44] : memref<12x128xf32, #tpu.memory_space<vmem>>, vector<1x128xf32>
    %cst_45 = arith.constant dense<0.000000e+00> : vector<16x128xf32>
    %101 = tpu.matmul %95, %97, %cst_45 {dimension_numbers = #tpu.dot_dimension_numbers<[1], [0], [0], [1], [0, 0, 1, 1], [], []>} : vector<16x128xf32>, vector<128x128xf32>, vector<16x128xf32> -> vector<16x128xf32>
    %102 = vector.broadcast %98 : vector<1x128xf32> to vector<16x128xf32>
    %103 = arith.addf %101, %102 : vector<16x128xf32>
    %cst_46 = arith.constant dense<0.000000e+00> : vector<16xf32>
    %104 = vector.multi_reduction <add>, %103, %cst_46 [1] : vector<16x128xf32> to vector<16xf32>
    %105 = vector.shape_cast %104 : vector<16xf32> to vector<16x1xf32>
    %cst_47 = arith.constant 1.562500e-02 : f32
    %106 = vector.broadcast %cst_47 : f32 to vector<16x1xf32>
    %107 = arith.mulf %105, %106 : vector<16x1xf32>
    %108 = arith.mulf %103, %103 : vector<16x128xf32>
    %cst_48 = arith.constant dense<0.000000e+00> : vector<16xf32>
    %109 = vector.multi_reduction <add>, %108, %cst_48 [1] : vector<16x128xf32> to vector<16xf32>
    %110 = vector.shape_cast %109 : vector<16xf32> to vector<16x1xf32>
    %cst_49 = arith.constant 1.562500e-02 : f32
    %111 = vector.broadcast %cst_49 : f32 to vector<16x1xf32>
    %112 = arith.mulf %110, %111 : vector<16x1xf32>
    %113 = arith.mulf %107, %107 : vector<16x1xf32>
    %114 = arith.subf %112, %113 : vector<16x1xf32>
    %115 = vector.broadcast %107 : vector<16x1xf32> to vector<16x128xf32>
    %116 = arith.subf %103, %115 : vector<16x128xf32>
    %cst_50 = arith.constant 9.99999974E-6 : f32
    %117 = vector.broadcast %cst_50 : f32 to vector<16x1xf32>
    %118 = arith.addf %114, %117 : vector<16x1xf32>
    %119 = math.rsqrt %118 : vector<16x1xf32>
    %120 = vector.broadcast %119 : vector<16x1xf32> to vector<16x128xf32>
    %121 = arith.mulf %116, %120 : vector<16x128xf32>
    %122 = vector.broadcast %99 : vector<1x128xf32> to vector<16x128xf32>
    %123 = arith.mulf %121, %122 : vector<16x128xf32>
    %124 = vector.broadcast %100 : vector<1x128xf32> to vector<16x128xf32>
    %125 = arith.addf %123, %124 : vector<16x128xf32>
    %cst_51 = arith.constant 0.000000e+00 : f32
    %126 = vector.broadcast %cst_51 : f32 to vector<16x128xf32>
    %127 = arith.maximumf %125, %126 : vector<16x128xf32>
    %c0_52 = arith.constant 0 : index
    %c0_53 = arith.constant 0 : index
    %128 = vector.load %arg5[%c0_52, %c0_53] : memref<128x128xf32, #tpu.memory_space<vmem>>, vector<128x128xf32>
    %cst_54 = arith.constant dense<0.000000e+00> : vector<16x128xf32>
    %129 = tpu.matmul %127, %128, %cst_54 {dimension_numbers = #tpu.dot_dimension_numbers<[1], [0], [0], [1], [0, 0, 1, 1], [], []>} : vector<16x128xf32>, vector<128x128xf32>, vector<16x128xf32> -> vector<16x128xf32>
    %c0_55 = arith.constant 0 : index
    %c0_56 = arith.constant 0 : index
    %130 = vector.load %arg6[%c0_55, %c0_56] : memref<1x128xf32, #tpu.memory_space<vmem>>, vector<1x128xf32>
    %131 = vector.broadcast %130 : vector<1x128xf32> to vector<16x128xf32>
    %132 = arith.addf %129, %131 : vector<16x128xf32>
    %c0_57 = arith.constant 0 : index
    %c0_58 = arith.constant 0 : index
    %133 = vector.load %arg7[%c0_57, %c0_58] : memref<16x128xf32, #tpu.memory_space<vmem>>, vector<16x128xf32>
    tpu.vector_store %arg7[%c0_57, %c0_58], %132 {strides = array<i32>} : memref<16x128xf32, #tpu.memory_space<vmem>>, vector<16x128xf32>,
    return
  }
  func.func @transform_0(%arg0: i32) -> (i32, i32) {
    %c0_i32 = arith.constant 0 : i32
    %c0_i32_0 = arith.constant 0 : i32
    return %arg0, %c0_i32 : i32, i32
  }
  func.func @transform_1(%arg0: i32) -> (i32, i32) {
    %c0_i32 = arith.constant 0 : i32
    %c0_i32_0 = arith.constant 0 : i32
    %c0_i32_1 = arith.constant 0 : i32
    return %c0_i32, %c0_i32_0 : i32, i32
  }
  func.func @transform_2(%arg0: i32) -> (i32, i32, i32) {
    %c0_i32 = arith.constant 0 : i32
    %c0_i32_0 = arith.constant 0 : i32
    %c0_i32_1 = arith.constant 0 : i32
    %c0_i32_2 = arith.constant 0 : i32
    return %c0_i32, %c0_i32_0, %c0_i32_1 : i32, i32, i32
  }
  func.func @transform_3(%arg0: i32) -> (i32, i32) {
    %c0_i32 = arith.constant 0 : i32
    %c0_i32_0 = arith.constant 0 : i32
    %c0_i32_1 = arith.constant 0 : i32
    return %c0_i32, %c0_i32_0 : i32, i32
  }
  func.func @transform_4(%arg0: i32) -> (i32, i32) {
    %c0_i32 = arith.constant 0 : i32
    %c0_i32_0 = arith.constant 0 : i32
    %c0_i32_1 = arith.constant 0 : i32
    return %c0_i32, %c0_i32_0 : i32, i32
  }
  func.func @transform_5(%arg0: i32) -> (i32, i32) {
    %c0_i32 = arith.constant 0 : i32
    %c0_i32_0 = arith.constant 0 : i32
    %c0_i32_1 = arith.constant 0 : i32
    return %c0_i32, %c0_i32_0 : i32, i32
  }
  func.func @transform_6(%arg0: i32) -> (i32, i32) {
    %c0_i32 = arith.constant 0 : i32
    %c0_i32_0 = arith.constant 0 : i32
    return %arg0, %c0_i32 : i32, i32
  }
}

module attributes {stable_mosaic.version = 11 : i64} {
  func.func @qstar_kernel(%arg0: i32, %arg1: memref<16x32xf32, #tpu.memory_space<vmem>>, %arg2: memref<32x128xf32, #tpu.memory_space<vmem>>, %arg3: memref<3x128x128xf32, #tpu.memory_space<vmem>>, %arg4: memref<12x128xf32, #tpu.memory_space<vmem>>, %arg5: memref<128x128xf32, #tpu.memory_space<vmem>>, %arg6: memref<1x128xf32, #tpu.memory_space<vmem>>, %arg7: memref<16x128xf32, #tpu.memory_space<vmem>>) attributes {dimension_semantics = [#tpu.dimension_semantics<parallel>], iteration_bounds = array<i64: 1>, scalar_prefetch = 0 : i64, scratch_operands = 0 : i64, tpu.core_type = #tpu.core_type<tc>, window_params = [{transform_indices = @transform_0, window_bounds = array<i64: 16, 32>}, {pipeline_mode = #tpu.pipeline_mode<synchronous>, transform_indices = @transform_1, window_bounds = array<i64: 32, 128>}, {pipeline_mode = #tpu.pipeline_mode<synchronous>, transform_indices = @transform_2, window_bounds = array<i64: 3, 128, 128>}, {pipeline_mode = #tpu.pipeline_mode<synchronous>, transform_indices = @transform_3, window_bounds = array<i64: 12, 128>}, {pipeline_mode = #tpu.pipeline_mode<synchronous>, transform_indices = @transform_4, window_bounds = array<i64: 128, 128>}, {pipeline_mode = #tpu.pipeline_mode<synchronous>, transform_indices = @transform_5, window_bounds = array<i64: 1, 128>}, {transform_indices = @transform_6, window_bounds = array<i64: 16, 128>}]} {
    %c0 = arith.constant 0 : index
    %c0_0 = arith.constant 0 : index
    %0 = vector.load %arg1[%c0, %c0_0] : memref<16x32xf32, #tpu.memory_space<vmem>>, vector<16x32xf32>
    %c0_1 = arith.constant 0 : index
    %c0_2 = arith.constant 0 : index
    %1 = vector.load %arg2[%c0_1, %c0_2] : memref<32x128xf32, #tpu.memory_space<vmem>>, vector<32x128xf32>
    %c0_3 = arith.constant 0 : index
    %c0_4 = arith.constant 0 : index
    %2 = vector.load %arg4[%c0_3, %c0_4] : memref<12x128xf32, #tpu.memory_space<vmem>>, vector<1x128xf32>
    %c1 = arith.constant 1 : index
    %c0_5 = arith.constant 0 : index
    %3 = vector.load %arg4[%c1, %c0_5] : memref<12x128xf32, #tpu.memory_space<vmem>>, vector<1x128xf32>
    %c2 = arith.constant 2 : index
    %c0_6 = arith.constant 0 : index
    %4 = vector.load %arg4[%c2, %c0_6] : memref<12x128xf32, #tpu.memory_space<vmem>>, vector<1x128xf32>
    %cst = arith.constant dense<0.000000e+00> : vector<16x128xf32>
    %5 = tpu.matmul %0, %1, %cst {dimension_numbers = #tpu.dot_dimension_numbers<[1], [0], [0], [1], [0, 0, 1, 1], [], []>} : vector<16x32xf32>, vector<32x128xf32>, vector<16x128xf32> -> vector<16x128xf32>
    %6 = vector.broadcast %2 : vector<1x128xf32> to vector<16x128xf32>
    %7 = arith.addf %5, %6 : vector<16x128xf32>
    %cst_7 = arith.constant dense<0.000000e+00> : vector<16xf32>
    %8 = vector.multi_reduction <add>, %7, %cst_7 [1] : vector<16x128xf32> to vector<16xf32>
    %9 = vector.shape_cast %8 : vector<16xf32> to vector<16x1xf32>
    %cst_8 = arith.constant 1.562500e-02 : f32
    %10 = vector.broadcast %cst_8 : f32 to vector<16x1xf32>
    %11 = arith.mulf %9, %10 : vector<16x1xf32>
    %12 = arith.mulf %7, %7 : vector<16x128xf32>
    %cst_9 = arith.constant dense<0.000000e+00> : vector<16xf32>
    %13 = vector.multi_reduction <add>, %12, %cst_9 [1] : vector<16x128xf32> to vector<16xf32>
    %14 = vector.shape_cast %13 : vector<16xf32> to vector<16x1xf32>
    %cst_10 = arith.constant 1.562500e-02 : f32
    %15 = vector.broadcast %cst_10 : f32 to vector<16x1xf32>
    %16 = arith.mulf %14, %15 : vector<16x1xf32>
    %17 = arith.mulf %11, %11 : vector<16x1xf32>
    %18 = arith.subf %16, %17 : vector<16x1xf32>
    %19 = vector.broadcast %11 : vector<16x1xf32> to vector<16x128xf32>
    %20 = arith.subf %7, %19 : vector<16x128xf32>
    %cst_11 = arith.constant 9.99999974E-6 : f32
    %21 = vector.broadcast %cst_11 : f32 to vector<16x1xf32>
    %22 = arith.addf %18, %21 : vector<16x1xf32>
    %23 = math.rsqrt %22 : vector<16x1xf32>
    %24 = vector.broadcast %23 : vector<16x1xf32> to vector<16x128xf32>
    %25 = arith.mulf %20, %24 : vector<16x128xf32>
    %26 = vector.broadcast %3 : vector<1x128xf32> to vector<16x128xf32>
    %27 = arith.mulf %25, %26 : vector<16x128xf32>
    %28 = vector.broadcast %4 : vector<1x128xf32> to vector<16x128xf32>
    %29 = arith.addf %27, %28 : vector<16x128xf32>
    %cst_12 = arith.constant 0.000000e+00 : f32
    %30 = vector.broadcast %cst_12 : f32 to vector<16x128xf32>
    %31 = arith.maximumf %29, %30 : vector<16x128xf32>
    %c0_13 = arith.constant 0 : index
    %c0_14 = arith.constant 0 : index
    %c0_15 = arith.constant 0 : index
    %32 = vector.load %arg3[%c0_13, %c0_14, %c0_15] : memref<3x128x128xf32, #tpu.memory_space<vmem>>, vector<1x128x128xf32>
    %33 = vector.shape_cast %32 : vector<1x128x128xf32> to vector<128x128xf32>
    %c3 = arith.constant 3 : index
    %c0_16 = arith.constant 0 : index
    %34 = vector.load %arg4[%c3, %c0_16] : memref<12x128xf32, #tpu.memory_space<vmem>>, vector<1x128xf32>
    %c4 = arith.constant 4 : index
    %c0_17 = arith.constant 0 : index
    %35 = vector.load %arg4[%c4, %c0_17] : memref<12x128xf32, #tpu.memory_space<vmem>>, vector<1x128xf32>
    %c5 = arith.constant 5 : index
    %c0_18 = arith.constant 0 : index
    %36 = vector.load %arg4[%c5, %c0_18] : memref<12x128xf32, #tpu.memory_space<vmem>>, vector<1x128xf32>
    %cst_19 = arith.constant dense<0.000000e+00> : vector<16x128xf32>
    %37 = tpu.matmul %31, %33, %cst_19 {dimension_numbers = #tpu.dot_dimension_numbers<[1], [0], [0], [1], [0, 0, 1, 1], [], []>} : vector<16x128xf32>, vector<128x128xf32>, vector<16x128xf32> -> vector<16x128xf32>
    %38 = vector.broadcast %34 : vector<1x128xf32> to vector<16x128xf32>
    %39 = arith.addf %37, %38 : vector<16x128xf32>
    %cst_20 = arith.constant dense<0.000000e+00> : vector<16xf32>
    %40 = vector.multi_reduction <add>, %39, %cst_20 [1] : vector<16x128xf32> to vector<16xf32>
    %41 = vector.shape_cast %40 : vector<16xf32> to vector<16x1xf32>
    %cst_21 = arith.constant 1.562500e-02 : f32
    %42 = vector.broadcast %cst_21 : f32 to vector<16x1xf32>
    %43 = arith.mulf %41, %42 : vector<16x1xf32>
    %44 = arith.mulf %39, %39 : vector<16x128xf32>
    %cst_22 = arith.constant dense<0.000000e+00> : vector<16xf32>
    %45 = vector.multi_reduction <add>, %44, %cst_22 [1] : vector<16x128xf32> to vector<16xf32>
    %46 = vector.shape_cast %45 : vector<16xf32> to vector<16x1xf32>
    %cst_23 = arith.constant 1.562500e-02 : f32
    %47 = vector.broadcast %cst_23 : f32 to vector<16x1xf32>
    %48 = arith.mulf %46, %47 : vector<16x1xf32>
    %49 = arith.mulf %43, %43 : vector<16x1xf32>
    %50 = arith.subf %48, %49 : vector<16x1xf32>
    %51 = vector.broadcast %43 : vector<16x1xf32> to vector<16x128xf32>
    %52 = arith.subf %39, %51 : vector<16x128xf32>
    %cst_24 = arith.constant 9.99999974E-6 : f32
    %53 = vector.broadcast %cst_24 : f32 to vector<16x1xf32>
    %54 = arith.addf %50, %53 : vector<16x1xf32>
    %55 = math.rsqrt %54 : vector<16x1xf32>
    %56 = vector.broadcast %55 : vector<16x1xf32> to vector<16x128xf32>
    %57 = arith.mulf %52, %56 : vector<16x128xf32>
    %58 = vector.broadcast %35 : vector<1x128xf32> to vector<16x128xf32>
    %59 = arith.mulf %57, %58 : vector<16x128xf32>
    %60 = vector.broadcast %36 : vector<1x128xf32> to vector<16x128xf32>
    %61 = arith.addf %59, %60 : vector<16x128xf32>
    %cst_25 = arith.constant 0.000000e+00 : f32
    %62 = vector.broadcast %cst_25 : f32 to vector<16x128xf32>
    %63 = arith.maximumf %61, %62 : vector<16x128xf32>
    %c1_26 = arith.constant 1 : index
    %c0_27 = arith.constant 0 : index
    %c0_28 = arith.constant 0 : index
    %64 = vector.load %arg3[%c1_26, %c0_27, %c0_28] : memref<3x128x128xf32, #tpu.memory_space<vmem>>, vector<1x128x128xf32>
    %65 = vector.shape_cast %64 : vector<1x128x128xf32> to vector<128x128xf32>
    %c6 = arith.constant 6 : index
    %c0_29 = arith.constant 0 : index
    %66 = vector.load %arg4[%c6, %c0_29] : memref<12x128xf32, #tpu.memory_space<vmem>>, vector<1x128xf32>
    %c7 = arith.constant 7 : index
    %c0_30 = arith.constant 0 : index
    %67 = vector.load %arg4[%c7, %c0_30] : memref<12x128xf32, #tpu.memory_space<vmem>>, vector<1x128xf32>
    %c8 = arith.constant 8 : index
    %c0_31 = arith.constant 0 : index
    %68 = vector.load %arg4[%c8, %c0_31] : memref<12x128xf32, #tpu.memory_space<vmem>>, vector<1x128xf32>
    %cst_32 = arith.constant dense<0.000000e+00> : vector<16x128xf32>
    %69 = tpu.matmul %63, %65, %cst_32 {dimension_numbers = #tpu.dot_dimension_numbers<[1], [0], [0], [1], [0, 0, 1, 1], [], []>} : vector<16x128xf32>, vector<128x128xf32>, vector<16x128xf32> -> vector<16x128xf32>
    %70 = vector.broadcast %66 : vector<1x128xf32> to vector<16x128xf32>
    %71 = arith.addf %69, %70 : vector<16x128xf32>
    %cst_33 = arith.constant dense<0.000000e+00> : vector<16xf32>
    %72 = vector.multi_reduction <add>, %71, %cst_33 [1] : vector<16x128xf32> to vector<16xf32>
    %73 = vector.shape_cast %72 : vector<16xf32> to vector<16x1xf32>
    %cst_34 = arith.constant 1.562500e-02 : f32
    %74 = vector.broadcast %cst_34 : f32 to vector<16x1xf32>
    %75 = arith.mulf %73, %74 : vector<16x1xf32>
    %76 = arith.mulf %71, %71 : vector<16x128xf32>
    %cst_35 = arith.constant dense<0.000000e+00> : vector<16xf32>
    %77 = vector.multi_reduction <add>, %76, %cst_35 [1] : vector<16x128xf32> to vector<16xf32>
    %78 = vector.shape_cast %77 : vector<16xf32> to vector<16x1xf32>
    %cst_36 = arith.constant 1.562500e-02 : f32
    %79 = vector.broadcast %cst_36 : f32 to vector<16x1xf32>
    %80 = arith.mulf %78, %79 : vector<16x1xf32>
    %81 = arith.mulf %75, %75 : vector<16x1xf32>
    %82 = arith.subf %80, %81 : vector<16x1xf32>
    %83 = vector.broadcast %75 : vector<16x1xf32> to vector<16x128xf32>
    %84 = arith.subf %71, %83 : vector<16x128xf32>
    %cst_37 = arith.constant 9.99999974E-6 : f32
    %85 = vector.broadcast %cst_37 : f32 to vector<16x1xf32>
    %86 = arith.addf %82, %85 : vector<16x1xf32>
    %87 = math.rsqrt %86 : vector<16x1xf32>
    %88 = vector.broadcast %87 : vector<16x1xf32> to vector<16x128xf32>
    %89 = arith.mulf %84, %88 : vector<16x128xf32>
    %90 = vector.broadcast %67 : vector<1x128xf32> to vector<16x128xf32>
    %91 = arith.mulf %89, %90 : vector<16x128xf32>
    %92 = vector.broadcast %68 : vector<1x128xf32> to vector<16x128xf32>
    %93 = arith.addf %91, %92 : vector<16x128xf32>
    %cst_38 = arith.constant 0.000000e+00 : f32
    %94 = vector.broadcast %cst_38 : f32 to vector<16x128xf32>
    %95 = arith.maximumf %93, %94 : vector<16x128xf32>
    %c2_39 = arith.constant 2 : index
    %c0_40 = arith.constant 0 : index
    %c0_41 = arith.constant 0 : index
    %96 = vector.load %arg3[%c2_39, %c0_40, %c0_41] : memref<3x128x128xf32, #tpu.memory_space<vmem>>, vector<1x128x128xf32>
    %97 = vector.shape_cast %96 : vector<1x128x128xf32> to vector<128x128xf32>
    %c9 = arith.constant 9 : index
    %c0_42 = arith.constant 0 : index
    %98 = vector.load %arg4[%c9, %c0_42] : memref<12x128xf32, #tpu.memory_space<vmem>>, vector<1x128xf32>
    %c10 = arith.constant 10 : index
    %c0_43 = arith.constant 0 : index
    %99 = vector.load %arg4[%c10, %c0_43] : memref<12x128xf32, #tpu.memory_space<vmem>>, vector<1x128xf32>
    %c11 = arith.constant 11 : index
    %c0_44 = arith.constant 0 : index
    %100 = vector.load %arg4[%c11, %c0_44] : memref<12x128xf32, #tpu.memory_space<vmem>>, vector<1x128xf32>
    %cst_45 = arith.constant dense<0.000000e+00> : vector<16x128xf32>
    %101 = tpu.matmul %95, %97, %cst_45 {dimension_numbers = #tpu.dot_dimension_numbers<[1], [0], [0], [1], [0, 0, 1, 1], [], []>} : vector<16x128xf32>, vector<128x128xf32>, vector<16x128xf32> -> vector<16x128xf32>
    %102 = vector.broadcast %98 : vector<1x128xf32> to vector<16x128xf32>
    %103 = arith.addf %101, %102 : vector<16x128xf32>
    %cst_46 = arith.constant dense<0.000000e+00> : vector<16xf32>
    %104 = vector.multi_reduction <add>, %103, %cst_46 [1] : vector<16x128xf32> to vector<16xf32>
    %105 = vector.shape_cast %104 : vector<16xf32> to vector<16x1xf32>
    %cst_47 = arith.constant 1.562500e-02 : f32
    %106 = vector.broadcast %cst_47 : f32 to vector<16x1xf32>
    %107 = arith.mulf %105, %106 : vector<16x1xf32>
    %108 = arith.mulf %103, %103 : vector<16x128xf32>
    %cst_48 = arith.constant dense<0.000000e+00> : vector<16xf32>
    %109 = vector.multi_reduction <add>, %108, %cst_48 [1] : vector<16x128xf32> to vector<16xf32>
    %110 = vector.shape_cast %109 : vector<16xf32> to vector<16x1xf32>
    %cst_49 = arith.constant 1.562500e-02 : f32
    %111 = vector.broadcast %cst_49 : f32 to vector<16x1xf32>
    %112 = arith.mulf %110, %111 : vector<16x1xf32>
    %113 = arith.mulf %107, %107 : vector<16x1xf32>
    %114 = arith.subf %112, %113 : vector<16x1xf32>
    %115 = vector.broadcast %107 : vector<16x1xf32> to vector<16x128xf32>
    %116 = arith.subf %103, %115 : vector<16x128xf32>
    %cst_50 = arith.constant 9.99999974E-6 : f32
    %117 = vector.broadcast %cst_50 : f32 to vector<16x1xf32>
    %118 = arith.addf %114, %117 : vector<16x1xf32>
    %119 = math.rsqrt %118 : vector<16x1xf32>
    %120 = vector.broadcast %119 : vector<16x1xf32> to vector<16x128xf32>
    %121 = arith.mulf %116, %120 : vector<16x128xf32>
    %122 = vector.broadcast %99 : vector<1x128xf32> to vector<16x128xf32>
    %123 = arith.mulf %121, %122 : vector<16x128xf32>
    %124 = vector.broadcast %100 : vector<1x128xf32> to vector<16x128xf32>
    %125 = arith.addf %123, %124 : vector<16x128xf32>
    %cst_51 = arith.constant 0.000000e+00 : f32
    %126 = vector.broadcast %cst_51 : f32 to vector<16x128xf32>
    %127 = arith.maximumf %125, %126 : vector<16x128xf32>
    %c0_52 = arith.constant 0 : index
    %c0_53 = arith.constant 0 : index
    %128 = vector.load %arg5[%c0_52, %c0_53] : memref<128x128xf32, #tpu.memory_space<vmem>>, vector<128x128xf32>
    %cst_54 = arith.constant dense<0.000000e+00> : vector<16x128xf32>
    %129 = tpu.matmul %127, %128, %cst_54 {dimension_numbers = #tpu.dot_dimension_numbers<[1], [0], [0], [1], [0, 0, 1, 1], [], []>} : vector<16x128xf32>, vector<128x128xf32>, vector<16x128xf32> -> vector<16x128xf32>
    %c0_55 = arith.constant 0 : index
    %c0_56 = arith.constant 0 : index
    %130 = vector.load %arg6[%c0_55, %c0_56] : memref<1x128xf32, #tpu.memory_space<vmem>>, vector<1x128xf32>
    %131 = vector.broadcast %130 : vector<1x128xf32> to vector<16x128xf32>
    %132 = arith.addf %129, %131 : vector<16x128xf32>
    %c0_57 = arith.constant 0 : index
    %c0_58 = arith.constant 0 : index
    %133 = vector.load %arg7[%c0_57, %c0_58] : memref<16x128xf32, #tpu.memory_space<vmem>>, vector<16x128xf32>
    tpu.vector_store %arg7[%c0_57, %c0_58], %132 {strides = array<i32>} : memref<16x128xf32, #tpu.memory_space<vmem>>, vector<16x128xf32>,
    return
  }
  func.func @transform_0(%arg0: i32) -> (i32, i32) {
    %c0_i32 = arith.constant 0 : i32
    %c0_i32_0 = arith.constant 0 : i32
    return %arg0, %c0_i32 : i32, i32
  }
  func.func @transform_1(%arg0: i32) -> (i32, i32) {
    %c0_i32 = arith.constant 0 : i32
    %c0_i32_0 = arith.constant 0 : i32
    %c0_i32_1 = arith.constant 0 : i32
    return %c0_i32, %c0_i32_0 : i32, i32
  }
  func.func @transform_2(%arg0: i32) -> (i32, i32, i32) {
    %c0_i32 = arith.constant 0 : i32
    %c0_i32_0 = arith.constant 0 : i32
    %c0_i32_1 = arith.constant 0 : i32
    %c0_i32_2 = arith.constant 0 : i32
    return %c0_i32, %c0_i32_0, %c0_i32_1 : i32, i32, i32
  }
  func.func @transform_3(%arg0: i32) -> (i32, i32) {
    %c0_i32 = arith.constant 0 : i32
    %c0_i32_0 = arith.constant 0 : i32
    %c0_i32_1 = arith.constant 0 : i32
    return %c0_i32, %c0_i32_0 : i32, i32
  }
  func.func @transform_4(%arg0: i32) -> (i32, i32) {
    %c0_i32 = arith.constant 0 : i32
    %c0_i32_0 = arith.constant 0 : i32
    %c0_i32_1 = arith.constant 0 : i32
    return %c0_i32, %c0_i32_0 : i32, i32
  }
  func.func @transform_5(%arg0: i32) -> (i32, i32) {
    %c0_i32 = arith.constant 0 : i32
    %c0_i32_0 = arith.constant 0 : i32
    %c0_i32_1 = arith.constant 0 : i32
    return %c0_i32, %c0_i32_0 : i32, i32
  }
  func.func @transform_6(%arg0: i32) -> (i32, i32) {
    %c0_i32 = arith.constant 0 : i32
    %c0_i32_0 = arith.constant 0 : i32
    return %arg0, %c0_i32 : i32, i32
  }
}

</mosaic_0001>

<bundles_post_ra>
// kernel: tpu_custom_call.1
= control target key start
LH: loop header
LB: loop body
LE: loop exit
PB: predicated region body
PF: predicated region fallthrough
CT: control target
= control target key end

     0   :  { %11 = vsyncpa [#allocation3], 0  ;;  %s868_s0 = inlined_call_operand.hbm [shape: f32[16,32], index: 0, kind: input, shape index: {}]   ;;  %s869_s1 = inlined_call_operand.hbm [shape: f32[32,128], index: 1, kind: input, shape index: {}]   ;;  %s870_s2 = inlined_call_operand.hbm [shape: f32[3,128,128], index: 2, kind: input, shape index: {}]   ;;  %s871_s3 = inlined_call_operand.hbm [shape: f32[12,128], index: 3, kind: input, shape index: {}]   ;;  %s872_s4 = inlined_call_operand.hbm [shape: f32[128,128], index: 4, kind: input, shape index: {}]   ;;  %s873_s5 = inlined_call_operand.vmem [shape: f32[1,128], index: 5, kind: input, shape index: {}]   ;;  %s874_s6 = inlined_call_operand.hbm [shape: f32[16,128], index: 6, kind: output, shape index: {}]  }
   0x1   :  { %12 = vsyncpa [#allocation6], 0 }
   0x2   :  { %13 = vsyncpa [#allocation9], 0 }
   0x3   :  { %14 = vsyncpa [#allocation4], 0  ;;  %s32_s23 = sshll.u32 %s869_s1, 4  ;;  %s738_s24 = smov [#allocation5]   ;;  %s33_s23 = int_to_ptr.hbm [resolvable:$true] %s32_s23 }
   0x4   :  { %s34_s25 = sshll.u32 %s738_s24, 4  ;;  %s58_s28 = sshll.u32 %s871_s3, 4  ;;  %s35_s25 = int_to_ptr.vmem [resolvable:$true] %s34_s25  ;;  %s59_s28 = int_to_ptr.hbm [resolvable:$true] %s58_s28 }
   0x5   :  { %s739_s29 = smov 128   ;;  %s740_s30 = smov 8  }
   0x6   :  { %40 = dma.hbm_to_vmem [thread:$0]  %s33_s23, 512, %s35_s25, [#allocation6], %s739_s29, %s739_s29, %s740_s30  }
   0x7   :  { %s741_s7 = smov [#allocation8]   ;;  %s19_s1 = sshll.u32 %s868_s0, 4  ;;  %s20_s1 = int_to_ptr.hbm [resolvable:$true] %s19_s1 }
   0x8   :  { %s60_s8 = sshll.u32 %s741_s7, 4  ;;  %s45_s12 = sshll.u32 %s870_s2, 4  ;;  %s61_s8 = int_to_ptr.vmem [resolvable:$true] %s60_s8  ;;  %s46_s12 = int_to_ptr.hbm [resolvable:$true] %s45_s12 }
   0x9   :  { %66 = dma.hbm_to_vmem [thread:$0]  %s59_s28, 256, %s61_s8, [#allocation9], %s739_s29, %s739_s29, %s740_s30  }
   0xa   :  { %s742_s13 = smov [#allocation2]   ;;  %s743_s15 = smov [#allocation7]  }
   0xb   :  { %s21_s14 = sshll.u32 %s742_s13, 4  ;;  %s47_s0 = sshll.u32 %s743_s15, 4  ;;  %s22_s14 = int_to_ptr.vmem [resolvable:$true] %s21_s14  ;;  %s48_s0 = int_to_ptr.vmem [resolvable:$true] %s47_s0 }
   0xc   :  { %27 = dma.hbm_to_vmem [thread:$0]  %s20_s1, 256, %s22_s14, [#allocation3], %s739_s29, %s739_s29, %s740_s30  }
   0xd   :  { %s71_s18 = sshll.u32 %s872_s4, 4  ;;  %s744_s2 = smov [#allocation10]   ;;  %s72_s18 = int_to_ptr.hbm [resolvable:$true] %s71_s18 }
   0xe   :  { %53 = dma.hbm_to_vmem [thread:$0]  %s46_s12, 6144, %s48_s0, [#allocation6], %s739_s29, %s739_s29, %s740_s30  }
   0xf   :  { %s73_s19 = sshll.u32 %s744_s2, 4  ;;  %s74_s19 = int_to_ptr.vmem [resolvable:$true] %s73_s19 }
  0x10   :  { %79 = dma.hbm_to_vmem [thread:$0]  %s72_s18, 2048, %s74_s19, [#allocation9], %s739_s29, %s739_s29, %s740_s30  }
  0x11   :  { %730 = dma.done.wait [#allocation3], 256  }
  0x12   :  { %731 = vsyncadd [#allocation3], 4294967040 }
  0x13   :  { %732 = dma.done.wait [#allocation6], 6656  }
  0x14   :  { %733 = vsyncadd [#allocation6], 4294960640 }
  0x15   :  { %734 = dma.done.wait [#allocation9], 2304  }
  0x16   :  { %735 = vsyncadd [#allocation9], 4294964992  ;;  %v107_v0 = vld [vmem:[#allocation5 + $0x18] sm:$0xff]  ;;  %v106_v1 = vld [vmem:[#allocation5 + $0x10] sm:$0xff]  ;;  %vm112_vm0 = vcmask 261120   ;;  %s745_s21 = smov [#allocation11]  }
  0x17   :  { %131 = vmatpush.msra.mxu0 %v107_v0  ;;  %v105_v2 = vld [vmem:[#allocation5 + $0x8] sm:$0xff]  ;;  %v104_v3 = vld [vmem:[#allocation5] sm:$0xff]  ;;  %v102_v4 = vld [vmem:[#allocation2] sm:$0xff]  ;;  %s530_s22 = sshll.u32 %s745_s21, 4  ;;  %s532_s25 = sshll.u32 %s874_s6, 4  ;;  %s531_s22 = int_to_ptr.vmem [resolvable:$true] %s530_s22  ;;  %s533_s25 = int_to_ptr.hbm [resolvable:$true] %s532_s25 }
  0x18   :  { %v103_v5 = vld [vmem:[#allocation2 + $0x8] sm:$0xff]  ;;  %v557_v6 = vld [vmem:[#allocation8] ss:$0 sm:$0xff]  ;;  %v208_v14 = vld [vmem:[#allocation7 + $0x70] sm:$0xff] }
  0x19   :  { %132 = vmatpush.msra.mxu0 %v106_v1  ;;  %v209_v13 = vld [vmem:[#allocation7 + $0x78] sm:$0xff]  ;;  %v207_v15 = vld [vmem:[#allocation7 + $0x68] sm:$0xff]  ;;  %v206_v16 = vld [vmem:[#allocation7 + $0x60] sm:$0xff] }
  0x1a   :  { %214 = vmatpush.msra.mxu1 %v209_v13  ;;  %v205_v17 = vld [vmem:[#allocation7 + $0x58] sm:$0xff]  ;;  %v204_v18 = vld [vmem:[#allocation7 + $0x50] sm:$0xff]  ;;  %v203_v19 = vld [vmem:[#allocation7 + $0x48] sm:$0xff] }
  0x1b   :  { %133 = vmatpush.msra.mxu0 %v105_v2  ;;  %v202_v20 = vld [vmem:[#allocation7 + $0x40] sm:$0xff]  ;;  %v201_v21 = vld [vmem:[#allocation7 + $0x38] sm:$0xff]  ;;  %v200_v22 = vld [vmem:[#allocation7 + $0x30] sm:$0xff] }
  0x1c   :  { %215 = vmatpush.msra.mxu1 %v208_v14  ;;  %v199_v23 = vld [vmem:[#allocation7 + $0x28] sm:$0xff]  ;;  %v198_v24 = vld [vmem:[#allocation7 + $0x20] sm:$0xff]  ;;  %v197_v26 = vld [vmem:[#allocation7 + $0x18] sm:$0xff] }
  0x1d   :  { %134 = vmatpush.msra.mxu0 %v104_v3  ;;  %v196_v27 = vld [vmem:[#allocation7 + $0x10] sm:$0xff]  ;;  %v195_v28 = vld [vmem:[#allocation7 + $0x8] sm:$0xff]  ;;  %v194_v30 = vld [vmem:[#allocation7] sm:$0xff] }
  0x1e   :  { %547 = vmatmul.msk.f32.vlgmr.msra.gmra.mxu0 %vm112_vm0, %v102_v4  ;;  %216 = vmatpush.msra.mxu1 %v207_v15  ;;  %v558_v52 = vld [vmem:[#allocation8 + $0x1] ss:$0 sm:$0xff]  ;;  %v559_v56 = vld [vmem:[#allocation8 + $0x2] ss:$0 sm:$0xff]  ;;  %v304_v13 = vld [vmem:[#allocation7 + $0xf0] sm:$0xff] }
  0x1f   :  { %v303_v14 = vld [vmem:[#allocation7 + $0xe8] sm:$0xff]  ;;  %v302_v15 = vld [vmem:[#allocation7 + $0xe0] sm:$0xff] }
  0x20   :  { %217 = vmatpush.msra.mxu1 %v206_v16  ;;  %v301_v16 = vld [vmem:[#allocation7 + $0xd8] sm:$0xff] }
  0x22   :  { %218 = vmatpush.msra.mxu1 %v205_v17  ;;  %v300_v17 = vld [vmem:[#allocation7 + $0xd0] sm:$0xff] }
  0x24   :  { %219 = vmatpush.msra.mxu1 %v204_v18  ;;  %v299_v18 = vld [vmem:[#allocation7 + $0xc8] sm:$0xff] }
  0x26   :  { %548 = vmatmul.msk.f32.gmra.mxu0 %vm112_vm0, %v103_v5  ;;  %220 = vmatpush.msra.mxu1 %v203_v19  ;;  %v560_v5 = vld [vmem:[#allocation8 + $0x3] ss:$0 sm:$0xff] }
  0x27   :  { %v298_v19 = vld [vmem:[#allocation7 + $0xc0] sm:$0xff] }
  0x28   :  { %221 = vmatpush.msra.mxu1 %v202_v20  ;;  %v297_v20 = vld [vmem:[#allocation7 + $0xb8] sm:$0xff] }
  0x2a   :  { %222 = vmatpush.msra.mxu1 %v201_v21  ;;  %v296_v21 = vld [vmem:[#allocation7 + $0xb0] sm:$0xff] }
  0x2c   :  { %223 = vmatpush.msra.mxu1 %v200_v22  ;;  %v295_v22 = vld [vmem:[#allocation7 + $0xa8] sm:$0xff] }
  0x2e   :  { %224 = vmatpush.msra.mxu1 %v199_v23  ;;  %v294_v23 = vld [vmem:[#allocation7 + $0xa0] sm:$0xff] }
  0x30   :  { %225 = vmatpush.msra.mxu1 %v198_v24  ;;  %v293_v24 = vld [vmem:[#allocation7 + $0x98] sm:$0xff] }
  0x32   :  { %226 = vmatpush.msra.mxu1 %v197_v26  ;;  %v292_v26 = vld [vmem:[#allocation7 + $0x90] sm:$0xff] }
  0x34   :  { %227 = vmatpush.msra.mxu1 %v196_v27  ;;  %v291_v27 = vld [vmem:[#allocation7 + $0x88] sm:$0xff] }
  0x36   :  { %228 = vmatpush.msra.mxu1 %v195_v28 }
  0x38   :  { %229 = vmatpush.msra.mxu1 %v194_v30 }
  0x9b   :  { %v136_v7 = vpop.f32.mrf.mxu0 }
  0x9c   :  { %v811_v8 = vadd.f32 %v557_v6, %v136_v7 }
  0x9e   :  { %142 = vadd.xlane.f32.xlu0 %v811_v8  ;;  %v148_v11 = vmul.f32 %v811_v8, %v811_v8 }
  0xa3   :  { %v139_v9 = vpop.f32.mrf.mxu0 }
  0xa4   :  { %v814_v10 = vadd.f32 %v557_v6, %v139_v9 }
  0xa6   :  { %144 = vadd.xlane.f32.xlu1 %v814_v10  ;;  %150 = vadd.xlane.f32.xlu0 %v148_v11  ;;  %v149_v12 = vmul.f32 %v814_v10, %v814_v10 }
  0xae   :  { %152 = vadd.xlane.f32.xlu1 %v149_v12  ;;  %v305_v12 = vld [vmem:[#allocation7 + $0xf8] sm:$0xff] }
  0xaf   :  { %310 = vmatpush.msra.mxu2 %v305_v12  ;;  %v400_v12 = vld [vmem:[#allocation7 + $0x170] sm:$0xff] }
  0xb1   :  { %311 = vmatpush.msra.mxu2 %v304_v13  ;;  %v399_v13 = vld [vmem:[#allocation7 + $0x168] sm:$0xff] }
  0xb3   :  { %312 = vmatpush.msra.mxu2 %v303_v14  ;;  %v398_v14 = vld [vmem:[#allocation7 + $0x160] sm:$0xff] }
  0xb5   :  { %313 = vmatpush.msra.mxu2 %v302_v15  ;;  %v397_v15 = vld [vmem:[#allocation7 + $0x158] sm:$0xff] }
  0xb7   :  { %314 = vmatpush.msra.mxu2 %v301_v16  ;;  %v396_v16 = vld [vmem:[#allocation7 + $0x150] sm:$0xff] }
  0xb9   :  { %315 = vmatpush.msra.mxu2 %v300_v17  ;;  %v395_v17 = vld [vmem:[#allocation7 + $0x148] sm:$0xff] }
  0xbb   :  { %316 = vmatpush.msra.mxu2 %v299_v18  ;;  %v394_v18 = vld [vmem:[#allocation7 + $0x140] sm:$0xff] }
  0xbd   :  { %317 = vmatpush.msra.mxu2 %v298_v19  ;;  %v393_v19 = vld [vmem:[#allocation7 + $0x138] sm:$0xff] }
  0xbf   :  { %318 = vmatpush.msra.mxu2 %v297_v20  ;;  %v392_v20 = vld [vmem:[#allocation7 + $0x130] sm:$0xff] }
  0xc1   :  { %319 = vmatpush.msra.mxu2 %v296_v21  ;;  %v391_v21 = vld [vmem:[#allocation7 + $0x128] sm:$0xff] }
  0xc3   :  { %320 = vmatpush.msra.mxu2 %v295_v22  ;;  %v390_v22 = vld [vmem:[#allocation7 + $0x120] sm:$0xff] }
  0xc5   :  { %321 = vmatpush.msra.mxu2 %v294_v23  ;;  %v389_v23 = vld [vmem:[#allocation7 + $0x118] sm:$0xff] }
  0xc7   :  { %322 = vmatpush.msra.mxu2 %v293_v24  ;;  %v388_v24 = vld [vmem:[#allocation7 + $0x110] sm:$0xff] }
  0xc9   :  { %323 = vmatpush.msra.mxu2 %v292_v26  ;;  %v386_v26 = vld [vmem:[#allocation7 + $0x100] sm:$0xff] }
  0xcb   :  { %324 = vmatpush.msra.mxu2 %v291_v27 }
 0x111   :  { %v143_v25 = vpop.xlane.xlu0 %142 }
 0x112   :  { %v146_v29 = vmul.f32 0.015625, %v143_v25 }
 0x114   :  { %v156_v33 = vmul.f32 %v146_v29, %v146_v29  ;;  %v160_v51 = vsub.f32 %v811_v8, %v146_v29  ;;  %v290_v29 = vld [vmem:[#allocation7 + $0x80] sm:$0xff] }
 0x115   :  { %325 = vmatpush.msra.mxu2 %v290_v29 }
 0x119   :  { %v145_v31 = vpop.xlane.xlu1 %144  ;;  %v151_v32 = vpop.xlane.xlu0 %150 }
 0x11a   :  { %v154_v34 = vmul.f32 0.015625, %v151_v32  ;;  %v147_v36 = vmul.f32 0.015625, %v145_v31 }
 0x11c   :  { %v158_v35 = vsub.f32 %v154_v34, %v156_v33  ;;  %v157_v38 = vmul.f32 %v147_v36, %v147_v36  ;;  %v161_v62 = vsub.f32 %v814_v10, %v147_v36 }
 0x11e   :  { %v162_v37 = vadd.f32 1e-05, %v158_v35 }
 0x120   :  { %570 = vrsqrt.f32 %v162_v37  ;;  %vm170_vm2 = vweird.f32 %v162_v37 }
 0x121   :  { %v153_v39 = vpop.xlane.xlu1 %152 }
 0x122   :  { %v155_v40 = vmul.f32 0.015625, %v153_v39 }
 0x124   :  { %v159_v41 = vsub.f32 %v155_v40, %v157_v38 }
 0x126   :  { %v571_v42 = vpop.eup %570  ;;  %v163_v43 = vadd.f32 1e-05, %v159_v41 }
 0x127   :  { %v165_v44 = vmul.f32 %v571_v42, %v162_v37  ;;  %vm171_vm1 = vweird.f32 %v571_v42 }
 0x128   :  { %572 = vrsqrt.f32 %v163_v43  ;;  %vm172_vm3 = vmor %vm170_vm2, %vm171_vm1  ;;  %vm180_vm5 = vweird.f32 %v163_v43 }
 0x129   :  { %v166_v45 = vmul.f32 %v571_v42, %v165_v44 }
 0x12b   :  { %v167_v46 = vmul.f32 0.5, %v166_v45 }
 0x12d   :  { %v168_v47 = vsub.f32 1.5, %v167_v46 }
 0x12e   :  { %v573_v48 = vpop.eup %572 }
 0x12f   :  { %v175_v49 = vmul.f32 %v573_v48, %v163_v43  ;;  %v169_v50 = vmul.f32 %v571_v42, %v168_v47  ;;  %vm181_vm4 = vweird.f32 %v573_v48 }
 0x130   :  { %vm182_vm6 = vmor %vm180_vm5, %vm181_vm4 }
 0x131   :  { %v176_v53 = vmul.f32 %v573_v48, %v175_v49  ;;  %v173_v54 = vsel %vm172_vm3, %v571_v42, %v169_v50 }
 0x132   :  { %v184_v55 = vmul.f32 %v173_v54, %v160_v51  ;;  %v561_v54 = vld [vmem:[#allocation8 + $0x4] ss:$0 sm:$0xff] }
 0x133   :  { %v177_v57 = vmul.f32 0.5, %v176_v53 }
 0x134   :  { %v187_v58 = vmul.f32 %v558_v52, %v184_v55 }
 0x135   :  { %v178_v59 = vsub.f32 1.5, %v177_v57 }
 0x136   :  { %v190_v60 = vadd.f32 %v559_v56, %v187_v58 }
 0x137   :  { %v179_v61 = vmul.f32 %v573_v48, %v178_v59  ;;  %v562_v59 = vld [vmem:[#allocation8 + $0x5] ss:$0 sm:$0xff] }
 0x138   :  { %v192_v63 = vmax.f32 %v190_v60, 0.0 }
 0x139   :  { %v183_v0 = vsel %vm182_vm6, %v573_v48, %v179_v61 }
 0x13a   :  { %230 = vmatmul.f32.vlgmr.msra.gmra.mxu1 %v192_v63  ;;  %v185_v1 = vmul.f32 %v183_v0, %v161_v62 }
 0x13c   :  { %v188_v2 = vmul.f32 %v558_v52, %v185_v1 }
 0x13e   :  { %v191_v3 = vadd.f32 %v559_v56, %v188_v2 }
 0x140   :  { %v193_v4 = vmax.f32 %v191_v3, 0.0 }
 0x142   :  { %233 = vmatmul.f32.gmra.mxu1 %v193_v4  ;;  %v563_v4 = vld [vmem:[#allocation8 + $0x6] ss:$0 sm:$0xff] }
 0x1b7   :  { %v231_v6 = vpop.f32.mrf.mxu1 }
 0x1b8   :  { %v823_v7 = vadd.f32 %v560_v5, %v231_v6 }
 0x1ba   :  { %237 = vadd.xlane.f32.xlu2 %v823_v7  ;;  %v243_v10 = vmul.f32 %v823_v7, %v823_v7 }
 0x1bf   :  { %v234_v8 = vpop.f32.mrf.mxu1 }
 0x1c0   :  { %v826_v9 = vadd.f32 %v560_v5, %v234_v8 }
 0x1c2   :  { %239 = vadd.xlane.f32.xlu0 %v826_v9  ;;  %245 = vadd.xlane.f32.xlu2 %v243_v10  ;;  %v244_v11 = vmul.f32 %v826_v9, %v826_v9 }
 0x1c4   :  { %247 = vadd.xlane.f32.xlu1 %v244_v11  ;;  %v401_v11 = vld [vmem:[#allocation7 + $0x178] sm:$0xff] }
 0x1c5   :  { %406 = vmatpush.msra.mxu3 %v401_v11  ;;  %v495_v11 = vld [vmem:[#allocation10 + $0x70] sm:$0xff] }
 0x1c7   :  { %407 = vmatpush.msra.mxu3 %v400_v12  ;;  %v494_v12 = vld [vmem:[#allocation10 + $0x68] sm:$0xff] }
 0x1c9   :  { %408 = vmatpush.msra.mxu3 %v399_v13  ;;  %v493_v13 = vld [vmem:[#allocation10 + $0x60] sm:$0xff] }
 0x1cb   :  { %409 = vmatpush.msra.mxu3 %v398_v14  ;;  %v492_v14 = vld [vmem:[#allocation10 + $0x58] sm:$0xff] }
 0x1cd   :  { %410 = vmatpush.msra.mxu3 %v397_v15  ;;  %v491_v15 = vld [vmem:[#allocation10 + $0x50] sm:$0xff] }
 0x1cf   :  { %411 = vmatpush.msra.mxu3 %v396_v16  ;;  %v490_v16 = vld [vmem:[#allocation10 + $0x48] sm:$0xff] }
 0x1d1   :  { %412 = vmatpush.msra.mxu3 %v395_v17  ;;  %v489_v17 = vld [vmem:[#allocation10 + $0x40] sm:$0xff] }
 0x1d3   :  { %413 = vmatpush.msra.mxu3 %v394_v18  ;;  %v488_v18 = vld [vmem:[#allocation10 + $0x38] sm:$0xff] }
 0x1d5   :  { %414 = vmatpush.msra.mxu3 %v393_v19  ;;  %v487_v19 = vld [vmem:[#allocation10 + $0x30] sm:$0xff] }
 0x1d7   :  { %415 = vmatpush.msra.mxu3 %v392_v20  ;;  %v486_v20 = vld [vmem:[#allocation10 + $0x28] sm:$0xff] }
 0x1d9   :  { %416 = vmatpush.msra.mxu3 %v391_v21  ;;  %v485_v21 = vld [vmem:[#allocation10 + $0x20] sm:$0xff] }
 0x1db   :  { %417 = vmatpush.msra.mxu3 %v390_v22  ;;  %v484_v22 = vld [vmem:[#allocation10 + $0x18] sm:$0xff] }
 0x1dd   :  { %418 = vmatpush.msra.mxu3 %v389_v23  ;;  %v483_v23 = vld [vmem:[#allocation10 + $0x10] sm:$0xff] }
 0x1df   :  { %419 = vmatpush.msra.mxu3 %v388_v24  ;;  %v482_v24 = vld [vmem:[#allocation10 + $0x8] sm:$0xff] }
 0x22d   :  { %v238_v25 = vpop.xlane.xlu2 %237 }
 0x22e   :  { %v241_v28 = vmul.f32 0.015625, %v238_v25  ;;  %v387_v25 = vld [vmem:[#allocation7 + $0x108] sm:$0xff] }
 0x22f   :  { %420 = vmatpush.msra.mxu3 %v387_v25  ;;  %v481_v25 = vld [vmem:[#allocation10] sm:$0xff] }
 0x230   :  { %v251_v32 = vmul.f32 %v241_v28, %v241_v28  ;;  %v255_v53 = vsub.f32 %v823_v7, %v241_v28 }
 0x231   :  { %421 = vmatpush.msra.mxu3 %v386_v26 }
 0x235   :  { %v240_v30 = vpop.xlane.xlu0 %239  ;;  %v246_v31 = vpop.xlane.xlu2 %245 }
 0x236   :  { %v242_v33 = vmul.f32 0.015625, %v240_v30  ;;  %v249_v34 = vmul.f32 0.015625, %v246_v31 }
 0x237   :  { %v248_v35 = vpop.xlane.xlu1 %247 }
 0x238   :  { %v252_v36 = vmul.f32 %v242_v33, %v242_v33  ;;  %v253_v37 = vsub.f32 %v249_v34, %v251_v32  ;;  %v250_v38 = vmul.f32 0.015625, %v248_v35  ;;  %v256_v57 = vsub.f32 %v826_v9, %v242_v33 }
 0x23a   :  { %v257_v39 = vadd.f32 1e-05, %v253_v37  ;;  %v254_v40 = vsub.f32 %v250_v38, %v252_v36 }
 0x23c   :  { %574 = vrsqrt.f32 %v257_v39  ;;  %v258_v41 = vadd.f32 1e-05, %v254_v40  ;;  %vm265_vm8 = vweird.f32 %v257_v39 }
 0x23e   :  { %576 = vrsqrt.f32 %v258_v41  ;;  %vm275_vm11 = vweird.f32 %v258_v41 }
 0x242   :  { %v575_v42 = vpop.eup %574 }
 0x243   :  { %v260_v43 = vmul.f32 %v575_v42, %v257_v39  ;;  %vm266_vm7 = vweird.f32 %v575_v42 }
 0x244   :  { %v577_v44 = vpop.eup %576  ;;  %vm267_vm10 = vmor %vm265_vm8, %vm266_vm7 }
 0x245   :  { %v261_v45 = vmul.f32 %v575_v42, %v260_v43  ;;  %v270_v46 = vmul.f32 %v577_v44, %v258_v41  ;;  %vm276_vm9 = vweird.f32 %v577_v44 }
 0x246   :  { %vm277_vm12 = vmor %vm275_vm11, %vm276_vm9 }
 0x247   :  { %v262_v47 = vmul.f32 0.5, %v261_v45  ;;  %v271_v48 = vmul.f32 %v577_v44, %v270_v46 }
 0x249   :  { %v263_v49 = vsub.f32 1.5, %v262_v47  ;;  %v272_v50 = vmul.f32 0.5, %v271_v48 }
 0x24b   :  { %v273_v51 = vsub.f32 1.5, %v272_v50  ;;  %v264_v52 = vmul.f32 %v575_v42, %v263_v49  ;;  %v564_v50 = vld [vmem:[#allocation8 + $0x7] ss:$0 sm:$0xff] }
 0x24d   :  { %v268_v55 = vsel %vm267_vm10, %v575_v42, %v264_v52  ;;  %v274_v56 = vmul.f32 %v577_v44, %v273_v51 }
 0x24e   :  { %v279_v58 = vmul.f32 %v268_v55, %v255_v53 }
 0x24f   :  { %v278_v60 = vsel %vm277_vm12, %v577_v44, %v274_v56 }
 0x250   :  { %v282_v61 = vmul.f32 %v561_v54, %v279_v58  ;;  %v280_v62 = vmul.f32 %v278_v60, %v256_v57 }
 0x252   :  { %v285_v63 = vadd.f32 %v562_v59, %v282_v61  ;;  %v283_v1 = vmul.f32 %v561_v54, %v280_v62  ;;  %v565_v54 = vld [vmem:[#allocation8 + $0x8] ss:$0 sm:$0xff] }
 0x254   :  { %v287_v0 = vmax.f32 %v285_v63, 0.0  ;;  %v286_v2 = vadd.f32 %v562_v59, %v283_v1 }
 0x256   :  { %326 = vmatmul.f32.vlgmr.msra.gmra.mxu2 %v287_v0  ;;  %v288_v3 = vmax.f32 %v286_v2, 0.0 }
 0x25e   :  { %329 = vmatmul.f32.gmra.mxu2 %v288_v3  ;;  %v566_v3 = vld [vmem:[#allocation8 + $0x9] ss:$0 sm:$0xff] }
 0x2d9   :  { %v327_v5 = vpop.f32.mrf.mxu2 }
 0x2da   :  { %v835_v6 = vadd.f32 %v563_v4, %v327_v5 }
 0x2dc   :  { %333 = vadd.xlane.f32.xlu2 %v835_v6  ;;  %v339_v7 = vmul.f32 %v835_v6, %v835_v6 }
 0x2de   :  { %341 = vadd.xlane.f32.xlu0 %v339_v7 }
 0x2e1   :  { %v330_v8 = vpop.f32.mrf.mxu2 }
 0x2e2   :  { %v840_v9 = vadd.f32 %v563_v4, %v330_v8 }
 0x2e4   :  { %335 = vadd.xlane.f32.xlu1 %v840_v9  ;;  %v340_v10 = vmul.f32 %v840_v9, %v840_v9 }
 0x2e6   :  { %343 = vadd.xlane.f32.xlu2 %v340_v10  ;;  %v496_v10 = vld [vmem:[#allocation10 + $0x78] sm:$0xff] }
 0x2e7   :  { %501 = vmatpush.msrb.mxu0 %v496_v10 }
 0x2e9   :  { %502 = vmatpush.msrb.mxu0 %v495_v11 }
 0x2eb   :  { %503 = vmatpush.msrb.mxu0 %v494_v12 }
 0x2ed   :  { %504 = vmatpush.msrb.mxu0 %v493_v13 }
 0x2ef   :  { %505 = vmatpush.msrb.mxu0 %v492_v14 }
 0x2f1   :  { %506 = vmatpush.msrb.mxu0 %v491_v15 }
 0x2f3   :  { %507 = vmatpush.msrb.mxu0 %v490_v16 }
 0x2f5   :  { %508 = vmatpush.msrb.mxu0 %v489_v17 }
 0x2f7   :  { %509 = vmatpush.msrb.mxu0 %v488_v18 }
 0x2f9   :  { %510 = vmatpush.msrb.mxu0 %v487_v19 }
 0x2fb   :  { %511 = vmatpush.msrb.mxu0 %v486_v20 }
 0x2fd   :  { %512 = vmatpush.msrb.mxu0 %v485_v21 }
 0x2ff   :  { %513 = vmatpush.msrb.mxu0 %v484_v22 }
 0x301   :  { %514 = vmatpush.msrb.mxu0 %v483_v23 }
 0x303   :  { %515 = vmatpush.msrb.mxu0 %v482_v24 }
 0x305   :  { %516 = vmatpush.msrb.mxu0 %v481_v25 }
 0x34f   :  { %v334_v27 = vpop.xlane.xlu2 %333 }
 0x350   :  { %v337_v28 = vmul.f32 0.015625, %v334_v27 }
 0x351   :  { %v342_v29 = vpop.xlane.xlu0 %341 }
 0x352   :  { %v347_v30 = vmul.f32 %v337_v28, %v337_v28  ;;  %v345_v31 = vmul.f32 0.015625, %v342_v29  ;;  %v351_v49 = vsub.f32 %v835_v6, %v337_v28 }
 0x354   :  { %v349_v32 = vsub.f32 %v345_v31, %v347_v30 }
 0x356   :  { %v353_v33 = vadd.f32 1e-05, %v349_v32 }
 0x357   :  { %v336_v34 = vpop.xlane.xlu1 %335 }
 0x358   :  { %578 = vrsqrt.f32 %v353_v33  ;;  %v338_v35 = vmul.f32 0.015625, %v336_v34  ;;  %vm361_vm14 = vweird.f32 %v353_v33 }
 0x359   :  { %v344_v36 = vpop.xlane.xlu2 %343 }
 0x35a   :  { %v348_v37 = vmul.f32 %v338_v35, %v338_v35  ;;  %v346_v38 = vmul.f32 0.015625, %v344_v36  ;;  %v352_v60 = vsub.f32 %v840_v9, %v338_v35 }
 0x35c   :  { %v350_v39 = vsub.f32 %v346_v38, %v348_v37 }
 0x35e   :  { %v579_v40 = vpop.eup %578  ;;  %v354_v41 = vadd.f32 1e-05, %v350_v39 }
 0x35f   :  { %v356_v42 = vmul.f32 %v579_v40, %v353_v33  ;;  %vm362_vm13 = vweird.f32 %v579_v40 }
 0x360   :  { %580 = vrsqrt.f32 %v354_v41  ;;  %vm363_vm15 = vmor %vm361_vm14, %vm362_vm13  ;;  %vm371_vm1 = vweird.f32 %v354_v41 }
 0x361   :  { %v357_v43 = vmul.f32 %v579_v40, %v356_v42 }
 0x363   :  { %v358_v44 = vmul.f32 0.5, %v357_v43 }
 0x365   :  { %v359_v45 = vsub.f32 1.5, %v358_v44 }
 0x366   :  { %v581_v46 = vpop.eup %580 }
 0x367   :  { %v366_v47 = vmul.f32 %v581_v46, %v354_v41  ;;  %v360_v48 = vmul.f32 %v579_v40, %v359_v45  ;;  %vm372_vm0 = vweird.f32 %v581_v46 }
 0x368   :  { %vm373_vm2 = vmor %vm371_vm1, %vm372_vm0 }
 0x369   :  { %v367_v51 = vmul.f32 %v581_v46, %v366_v47  ;;  %v364_v52 = vsel %vm363_vm15, %v579_v40, %v360_v48 }
 0x36a   :  { %v375_v53 = vmul.f32 %v364_v52, %v351_v49  ;;  %v567_v49 = vld [vmem:[#allocation8 + $0xa] ss:$0 sm:$0xff] }
 0x36b   :  { %v368_v55 = vmul.f32 0.5, %v367_v51 }
 0x36c   :  { %v378_v56 = vmul.f32 %v564_v50, %v375_v53  ;;  %v568_v53 = vld [vmem:[#allocation8 + $0xb] ss:$0 sm:$0xff] }
 0x36d   :  { %v369_v57 = vsub.f32 1.5, %v368_v55 }
 0x36e   :  { %v381_v58 = vadd.f32 %v565_v54, %v378_v56 }
 0x36f   :  { %v370_v59 = vmul.f32 %v581_v46, %v369_v57 }
 0x370   :  { %v383_v61 = vmax.f32 %v381_v58, 0.0 }
 0x371   :  { %v374_v62 = vsel %vm373_vm2, %v581_v46, %v370_v59 }
 0x372   :  { %422 = vmatmul.f32.vlgmr.msra.gmra.mxu3 %v383_v61  ;;  %v376_v63 = vmul.f32 %v374_v62, %v352_v60 }
 0x374   :  { %v379_v0 = vmul.f32 %v564_v50, %v376_v63 }
 0x376   :  { %v382_v1 = vadd.f32 %v565_v54, %v379_v0 }
 0x378   :  { %v384_v2 = vmax.f32 %v382_v1, 0.0 }
 0x37a   :  { %425 = vmatmul.f32.gmra.mxu3 %v384_v2  ;;  %v569_v2 = vld [vmem:[%s873_s5] ss:$0 sm:$0xff] }
 0x3f5   :  { %v423_v4 = vpop.f32.mrf.mxu3 }
 0x3f6   :  { %v847_v5 = vadd.f32 %v566_v3, %v423_v4 }
 0x3f8   :  { %429 = vadd.xlane.f32.xlu0 %v847_v5  ;;  %v435_v6 = vmul.f32 %v847_v5, %v847_v5 }
 0x3fa   :  { %437 = vadd.xlane.f32.xlu1 %v435_v6 }
 0x3fd   :  { %v426_v7 = vpop.f32.mrf.mxu3 }
 0x3fe   :  { %v852_v8 = vadd.f32 %v566_v3, %v426_v7 }
 0x400   :  { %431 = vadd.xlane.f32.xlu2 %v852_v8  ;;  %v436_v9 = vmul.f32 %v852_v8, %v852_v8 }
 0x402   :  { %439 = vadd.xlane.f32.xlu0 %v436_v9 }
 0x46b   :  { %v430_v26 = vpop.xlane.xlu0 %429 }
 0x46c   :  { %v433_v27 = vmul.f32 0.015625, %v430_v26 }
 0x46d   :  { %v438_v28 = vpop.xlane.xlu1 %437 }
 0x46e   :  { %v443_v29 = vmul.f32 %v433_v27, %v433_v27  ;;  %v441_v30 = vmul.f32 0.015625, %v438_v28  ;;  %v447_v48 = vsub.f32 %v847_v5, %v433_v27 }
 0x470   :  { %v445_v31 = vsub.f32 %v441_v30, %v443_v29 }
 0x472   :  { %v449_v32 = vadd.f32 1e-05, %v445_v31 }
 0x473   :  { %v432_v33 = vpop.xlane.xlu2 %431 }
 0x474   :  { %582 = vrsqrt.f32 %v449_v32  ;;  %v434_v34 = vmul.f32 0.015625, %v432_v33  ;;  %vm457_vm4 = vweird.f32 %v449_v32 }
 0x475   :  { %v440_v35 = vpop.xlane.xlu0 %439 }
 0x476   :  { %v444_v36 = vmul.f32 %v434_v34, %v434_v34  ;;  %v442_v37 = vmul.f32 0.015625, %v440_v35  ;;  %v448_v59 = vsub.f32 %v852_v8, %v434_v34 }
 0x478   :  { %v446_v38 = vsub.f32 %v442_v37, %v444_v36 }
 0x47a   :  { %v583_v39 = vpop.eup %582  ;;  %v450_v40 = vadd.f32 1e-05, %v446_v38 }
 0x47b   :  { %v452_v41 = vmul.f32 %v583_v39, %v449_v32  ;;  %vm458_vm3 = vweird.f32 %v583_v39 }
 0x47c   :  { %584 = vrsqrt.f32 %v450_v40  ;;  %vm459_vm5 = vmor %vm457_vm4, %vm458_vm3  ;;  %vm467_vm7 = vweird.f32 %v450_v40 }
 0x47d   :  { %v453_v42 = vmul.f32 %v583_v39, %v452_v41 }
 0x47f   :  { %v454_v43 = vmul.f32 0.5, %v453_v42 }
 0x481   :  { %v455_v44 = vsub.f32 1.5, %v454_v43 }
 0x482   :  { %v585_v45 = vpop.eup %584 }
 0x483   :  { %v456_v46 = vmul.f32 %v583_v39, %v455_v44  ;;  %v462_v47 = vmul.f32 %v585_v45, %v450_v40  ;;  %vm468_vm6 = vweird.f32 %v585_v45 }
 0x484   :  { %vm469_vm8 = vmor %vm467_vm7, %vm468_vm6 }
 0x485   :  { %v463_v50 = vmul.f32 %v585_v45, %v462_v47  ;;  %v460_v51 = vsel %vm459_vm5, %v583_v39, %v456_v46 }
 0x486   :  { %v471_v52 = vmul.f32 %v460_v51, %v447_v48 }
 0x487   :  { %v464_v54 = vmul.f32 0.5, %v463_v50 }
 0x488   :  { %v474_v55 = vmul.f32 %v567_v49, %v471_v52 }
 0x489   :  { %v465_v56 = vsub.f32 1.5, %v464_v54 }
 0x48a   :  { %v477_v57 = vadd.f32 %v568_v53, %v474_v55 }
 0x48b   :  { %v466_v58 = vmul.f32 %v585_v45, %v465_v56 }
 0x48c   :  { %v479_v60 = vmax.f32 %v477_v57, 0.0 }
 0x48d   :  { %v470_v61 = vsel %vm469_vm8, %v585_v45, %v466_v58 }
 0x48e   :  { %517 = vmatmul.f32.vlgmr.msrb.gmra.mxu0 %v479_v60  ;;  %v472_v62 = vmul.f32 %v470_v61, %v448_v59 }
 0x490   :  { %v475_v63 = vmul.f32 %v567_v49, %v472_v62 }
 0x492   :  { %v478_v0 = vadd.f32 %v568_v53, %v475_v63 }
 0x494   :  { %v480_v1 = vmax.f32 %v478_v0, 0.0 }
 0x496   :  { %520 = vmatmul.f32.gmra.mxu0 %v480_v1 }
 0x50b   :  { %v518_v3 = vpop.f32.mrf.mxu0 }
 0x50c   :  { %v519_v4 = vadd.f32 %v569_v2, %v518_v3 }
 0x50e   :  { %524 = vst [vmem:[#allocation11] sm:$0xff] %v519_v4 }
 0x513   :  { %v521_v5 = vpop.f32.mrf.mxu0 }
 0x514   :  { %v522_v6 = vadd.f32 %v569_v2, %v521_v5 }
 0x516   :  { %525 = vst [vmem:[#allocation11 + $0x8] sm:$0xff] %v522_v6 }
 0x517   :  { %538 = dma.vmem_to_hbm [thread:$0]  %s531_s22, 256, %s533_s25, [#allocation4], %s739_s29, %s739_s29, %s740_s30  }
 0x518   :  { %736 = dma.done.wait [#allocation4], 256  }
 0x519   :  { %737 = vsyncadd [#allocation4], 4294967040 }
 0x51a   :  { %543 = vsyncpa [#allocation3], 1 }
 0x51b   :  { %544 = vsyncpa [#allocation6], 1 }
 0x51c   :  { %545 = vsyncpa [#allocation9], 1 }
 0x51d   :  { %546 = vsyncpa [#allocation4], 1 }

// kernel: tpu_custom_call.1
= control target key start
LH: loop header
LB: loop body
LE: loop exit
PB: predicated region body
PF: predicated region fallthrough
CT: control target
= control target key end

     0   :  { %11 = vsyncpa [#allocation3], 0  ;;  %s868_s0 = inlined_call_operand.hbm [shape: f32[16,32], index: 0, kind: input, shape index: {}]   ;;  %s869_s1 = inlined_call_operand.hbm [shape: f32[32,128], index: 1, kind: input, shape index: {}]   ;;  %s870_s2 = inlined_call_operand.hbm [shape: f32[3,128,128], index: 2, kind: input, shape index: {}]   ;;  %s871_s3 = inlined_call_operand.hbm [shape: f32[12,128], index: 3, kind: input, shape index: {}]   ;;  %s872_s4 = inlined_call_operand.hbm [shape: f32[128,128], index: 4, kind: input, shape index: {}]   ;;  %s873_s5 = inlined_call_operand.vmem [shape: f32[1,128], index: 5, kind: input, shape index: {}]   ;;  %s874_s6 = inlined_call_operand.hbm [shape: f32[16,128], index: 6, kind: output, shape index: {}]  }
   0x1   :  { %12 = vsyncpa [#allocation6], 0 }
   0x2   :  { %13 = vsyncpa [#allocation9], 0 }
   0x3   :  { %14 = vsyncpa [#allocation4], 0  ;;  %s32_s23 = sshll.u32 %s869_s1, 4  ;;  %s738_s24 = smov [#allocation5]   ;;  %s33_s23 = int_to_ptr.hbm [resolvable:$true] %s32_s23 }
   0x4   :  { %s34_s25 = sshll.u32 %s738_s24, 4  ;;  %s58_s28 = sshll.u32 %s871_s3, 4  ;;  %s35_s25 = int_to_ptr.vmem [resolvable:$true] %s34_s25  ;;  %s59_s28 = int_to_ptr.hbm [resolvable:$true] %s58_s28 }
   0x5   :  { %s739_s29 = smov 128   ;;  %s740_s30 = smov 8  }
   0x6   :  { %40 = dma.hbm_to_vmem [thread:$0]  %s33_s23, 512, %s35_s25, [#allocation6], %s739_s29, %s739_s29, %s740_s30  }
   0x7   :  { %s741_s7 = smov [#allocation8]   ;;  %s19_s1 = sshll.u32 %s868_s0, 4  ;;  %s20_s1 = int_to_ptr.hbm [resolvable:$true] %s19_s1 }
   0x8   :  { %s60_s8 = sshll.u32 %s741_s7, 4  ;;  %s45_s12 = sshll.u32 %s870_s2, 4  ;;  %s61_s8 = int_to_ptr.vmem [resolvable:$true] %s60_s8  ;;  %s46_s12 = int_to_ptr.hbm [resolvable:$true] %s45_s12 }
   0x9   :  { %66 = dma.hbm_to_vmem [thread:$0]  %s59_s28, 256, %s61_s8, [#allocation9], %s739_s29, %s739_s29, %s740_s30  }
   0xa   :  { %s742_s13 = smov [#allocation2]   ;;  %s743_s15 = smov [#allocation7]  }
   0xb   :  { %s21_s14 = sshll.u32 %s742_s13, 4  ;;  %s47_s0 = sshll.u32 %s743_s15, 4  ;;  %s22_s14 = int_to_ptr.vmem [resolvable:$true] %s21_s14  ;;  %s48_s0 = int_to_ptr.vmem [resolvable:$true] %s47_s0 }
   0xc   :  { %27 = dma.hbm_to_vmem [thread:$0]  %s20_s1, 256, %s22_s14, [#allocation3], %s739_s29, %s739_s29, %s740_s30  }
   0xd   :  { %s71_s18 = sshll.u32 %s872_s4, 4  ;;  %s744_s2 = smov [#allocation10]   ;;  %s72_s18 = int_to_ptr.hbm [resolvable:$true] %s71_s18 }
   0xe   :  { %53 = dma.hbm_to_vmem [thread:$0]  %s46_s12, 6144, %s48_s0, [#allocation6], %s739_s29, %s739_s29, %s740_s30  }
   0xf   :  { %s73_s19 = sshll.u32 %s744_s2, 4  ;;  %s74_s19 = int_to_ptr.vmem [resolvable:$true] %s73_s19 }
  0x10   :  { %79 = dma.hbm_to_vmem [thread:$0]  %s72_s18, 2048, %s74_s19, [#allocation9], %s739_s29, %s739_s29, %s740_s30  }
  0x11   :  { %730 = dma.done.wait [#allocation3], 256  }
  0x12   :  { %731 = vsyncadd [#allocation3], 4294967040 }
  0x13   :  { %732 = dma.done.wait [#allocation6], 6656  }
  0x14   :  { %733 = vsyncadd [#allocation6], 4294960640 }
  0x15   :  { %734 = dma.done.wait [#allocation9], 2304  }
  0x16   :  { %735 = vsyncadd [#allocation9], 4294964992  ;;  %v107_v0 = vld [vmem:[#allocation5 + $0x18] sm:$0xff]  ;;  %v106_v1 = vld [vmem:[#allocation5 + $0x10] sm:$0xff]  ;;  %vm112_vm0 = vcmask 261120   ;;  %s745_s21 = smov [#allocation11]  }
  0x17   :  { %131 = vmatpush.msra.mxu0 %v107_v0  ;;  %v105_v2 = vld [vmem:[#allocation5 + $0x8] sm:$0xff]  ;;  %v104_v3 = vld [vmem:[#allocation5] sm:$0xff]  ;;  %v102_v4 = vld [vmem:[#allocation2] sm:$0xff]  ;;  %s530_s22 = sshll.u32 %s745_s21, 4  ;;  %s532_s25 = sshll.u32 %s874_s6, 4  ;;  %s531_s22 = int_to_ptr.vmem [resolvable:$true] %s530_s22  ;;  %s533_s25 = int_to_ptr.hbm [resolvable:$true] %s532_s25 }
  0x18   :  { %v103_v5 = vld [vmem:[#allocation2 + $0x8] sm:$0xff]  ;;  %v557_v6 = vld [vmem:[#allocation8] ss:$0 sm:$0xff]  ;;  %v208_v14 = vld [vmem:[#allocation7 + $0x70] sm:$0xff] }
  0x19   :  { %132 = vmatpush.msra.mxu0 %v106_v1  ;;  %v209_v13 = vld [vmem:[#allocation7 + $0x78] sm:$0xff]  ;;  %v207_v15 = vld [vmem:[#allocation7 + $0x68] sm:$0xff]  ;;  %v206_v16 = vld [vmem:[#allocation7 + $0x60] sm:$0xff] }
  0x1a   :  { %214 = vmatpush.msra.mxu1 %v209_v13  ;;  %v205_v17 = vld [vmem:[#allocation7 + $0x58] sm:$0xff]  ;;  %v204_v18 = vld [vmem:[#allocation7 + $0x50] sm:$0xff]  ;;  %v203_v19 = vld [vmem:[#allocation7 + $0x48] sm:$0xff] }
  0x1b   :  { %133 = vmatpush.msra.mxu0 %v105_v2  ;;  %v202_v20 = vld [vmem:[#allocation7 + $0x40] sm:$0xff]  ;;  %v201_v21 = vld [vmem:[#allocation7 + $0x38] sm:$0xff]  ;;  %v200_v22 = vld [vmem:[#allocation7 + $0x30] sm:$0xff] }
  0x1c   :  { %215 = vmatpush.msra.mxu1 %v208_v14  ;;  %v199_v23 = vld [vmem:[#allocation7 + $0x28] sm:$0xff]  ;;  %v198_v24 = vld [vmem:[#allocation7 + $0x20] sm:$0xff]  ;;  %v197_v26 = vld [vmem:[#allocation7 + $0x18] sm:$0xff] }
  0x1d   :  { %134 = vmatpush.msra.mxu0 %v104_v3  ;;  %v196_v27 = vld [vmem:[#allocation7 + $0x10] sm:$0xff]  ;;  %v195_v28 = vld [vmem:[#allocation7 + $0x8] sm:$0xff]  ;;  %v194_v30 = vld [vmem:[#allocation7] sm:$0xff] }
  0x1e   :  { %547 = vmatmul.msk.f32.vlgmr.msra.gmra.mxu0 %vm112_vm0, %v102_v4  ;;  %216 = vmatpush.msra.mxu1 %v207_v15  ;;  %v558_v52 = vld [vmem:[#allocation8 + $0x1] ss:$0 sm:$0xff]  ;;  %v559_v56 = vld [vmem:[#allocation8 + $0x2] ss:$0 sm:$0xff]  ;;  %v304_v13 = vld [vmem:[#allocation7 + $0xf0] sm:$0xff] }
  0x1f   :  { %v303_v14 = vld [vmem:[#allocation7 + $0xe8] sm:$0xff]  ;;  %v302_v15 = vld [vmem:[#allocation7 + $0xe0] sm:$0xff] }
  0x20   :  { %217 = vmatpush.msra.mxu1 %v206_v16  ;;  %v301_v16 = vld [vmem:[#allocation7 + $0xd8] sm:$0xff] }
  0x22   :  { %218 = vmatpush.msra.mxu1 %v205_v17  ;;  %v300_v17 = vld [vmem:[#allocation7 + $0xd0] sm:$0xff] }
  0x24   :  { %219 = vmatpush.msra.mxu1 %v204_v18  ;;  %v299_v18 = vld [vmem:[#allocation7 + $0xc8] sm:$0xff] }
  0x26   :  { %548 = vmatmul.msk.f32.gmra.mxu0 %vm112_vm0, %v103_v5  ;;  %220 = vmatpush.msra.mxu1 %v203_v19  ;;  %v560_v5 = vld [vmem:[#allocation8 + $0x3] ss:$0 sm:$0xff] }
  0x27   :  { %v298_v19 = vld [vmem:[#allocation7 + $0xc0] sm:$0xff] }
  0x28   :  { %221 = vmatpush.msra.mxu1 %v202_v20  ;;  %v297_v20 = vld [vmem:[#allocation7 + $0xb8] sm:$0xff] }
  0x2a   :  { %222 = vmatpush.msra.mxu1 %v201_v21  ;;  %v296_v21 = vld [vmem:[#allocation7 + $0xb0] sm:$0xff] }
  0x2c   :  { %223 = vmatpush.msra.mxu1 %v200_v22  ;;  %v295_v22 = vld [vmem:[#allocation7 + $0xa8] sm:$0xff] }
  0x2e   :  { %224 = vmatpush.msra.mxu1 %v199_v23  ;;  %v294_v23 = vld [vmem:[#allocation7 + $0xa0] sm:$0xff] }
  0x30   :  { %225 = vmatpush.msra.mxu1 %v198_v24  ;;  %v293_v24 = vld [vmem:[#allocation7 + $0x98] sm:$0xff] }
  0x32   :  { %226 = vmatpush.msra.mxu1 %v197_v26  ;;  %v292_v26 = vld [vmem:[#allocation7 + $0x90] sm:$0xff] }
  0x34   :  { %227 = vmatpush.msra.mxu1 %v196_v27  ;;  %v291_v27 = vld [vmem:[#allocation7 + $0x88] sm:$0xff] }
  0x36   :  { %228 = vmatpush.msra.mxu1 %v195_v28 }
  0x38   :  { %229 = vmatpush.msra.mxu1 %v194_v30 }
  0x9b   :  { %v136_v7 = vpop.f32.mrf.mxu0 }
  0x9c   :  { %v811_v8 = vadd.f32 %v557_v6, %v136_v7 }
  0x9e   :  { %142 = vadd.xlane.f32.xlu0 %v811_v8  ;;  %v148_v11 = vmul.f32 %v811_v8, %v811_v8 }
  0xa3   :  { %v139_v9 = vpop.f32.mrf.mxu0 }
  0xa4   :  { %v814_v10 = vadd.f32 %v557_v6, %v139_v9 }
  0xa6   :  { %144 = vadd.xlane.f32.xlu1 %v814_v10  ;;  %150 = vadd.xlane.f32.xlu0 %v148_v11  ;;  %v149_v12 = vmul.f32 %v814_v10, %v814_v10 }
  0xae   :  { %152 = vadd.xlane.f32.xlu1 %v149_v12  ;;  %v305_v12 = vld [vmem:[#allocation7 + $0xf8] sm:$0xff] }
  0xaf   :  { %310 = vmatpush.msra.mxu2 %v305_v12  ;;  %v400_v12 = vld [vmem:[#allocation7 + $0x170] sm:$0xff] }
  0xb1   :  { %311 = vmatpush.msra.mxu2 %v304_v13  ;;  %v399_v13 = vld [vmem:[#allocation7 + $0x168] sm:$0xff] }
  0xb3   :  { %312 = vmatpush.msra.mxu2 %v303_v14  ;;  %v398_v14 = vld [vmem:[#allocation7 + $0x160] sm:$0xff] }
  0xb5   :  { %313 = vmatpush.msra.mxu2 %v302_v15  ;;  %v397_v15 = vld [vmem:[#allocation7 + $0x158] sm:$0xff] }
  0xb7   :  { %314 = vmatpush.msra.mxu2 %v301_v16  ;;  %v396_v16 = vld [vmem:[#allocation7 + $0x150] sm:$0xff] }
  0xb9   :  { %315 = vmatpush.msra.mxu2 %v300_v17  ;;  %v395_v17 = vld [vmem:[#allocation7 + $0x148] sm:$0xff] }
  0xbb   :  { %316 = vmatpush.msra.mxu2 %v299_v18  ;;  %v394_v18 = vld [vmem:[#allocation7 + $0x140] sm:$0xff] }
  0xbd   :  { %317 = vmatpush.msra.mxu2 %v298_v19  ;;  %v393_v19 = vld [vmem:[#allocation7 + $0x138] sm:$0xff] }
  0xbf   :  { %318 = vmatpush.msra.mxu2 %v297_v20  ;;  %v392_v20 = vld [vmem:[#allocation7 + $0x130] sm:$0xff] }
  0xc1   :  { %319 = vmatpush.msra.mxu2 %v296_v21  ;;  %v391_v21 = vld [vmem:[#allocation7 + $0x128] sm:$0xff] }
  0xc3   :  { %320 = vmatpush.msra.mxu2 %v295_v22  ;;  %v390_v22 = vld [vmem:[#allocation7 + $0x120] sm:$0xff] }
  0xc5   :  { %321 = vmatpush.msra.mxu2 %v294_v23  ;;  %v389_v23 = vld [vmem:[#allocation7 + $0x118] sm:$0xff] }
  0xc7   :  { %322 = vmatpush.msra.mxu2 %v293_v24  ;;  %v388_v24 = vld [vmem:[#allocation7 + $0x110] sm:$0xff] }
  0xc9   :  { %323 = vmatpush.msra.mxu2 %v292_v26  ;;  %v386_v26 = vld [vmem:[#allocation7 + $0x100] sm:$0xff] }
  0xcb   :  { %324 = vmatpush.msra.mxu2 %v291_v27 }
 0x111   :  { %v143_v25 = vpop.xlane.xlu0 %142 }
 0x112   :  { %v146_v29 = vmul.f32 0.015625, %v143_v25 }
 0x114   :  { %v156_v33 = vmul.f32 %v146_v29, %v146_v29  ;;  %v160_v51 = vsub.f32 %v811_v8, %v146_v29  ;;  %v290_v29 = vld [vmem:[#allocation7 + $0x80] sm:$0xff] }
 0x115   :  { %325 = vmatpush.msra.mxu2 %v290_v29 }
 0x119   :  { %v145_v31 = vpop.xlane.xlu1 %144  ;;  %v151_v32 = vpop.xlane.xlu0 %150 }
 0x11a   :  { %v154_v34 = vmul.f32 0.015625, %v151_v32  ;;  %v147_v36 = vmul.f32 0.015625, %v145_v31 }
 0x11c   :  { %v158_v35 = vsub.f32 %v154_v34, %v156_v33  ;;  %v157_v38 = vmul.f32 %v147_v36, %v147_v36  ;;  %v161_v62 = vsub.f32 %v814_v10, %v147_v36 }
 0x11e   :  { %v162_v37 = vadd.f32 1e-05, %v158_v35 }
 0x120   :  { %570 = vrsqrt.f32 %v162_v37  ;;  %vm170_vm2 = vweird.f32 %v162_v37 }
 0x121   :  { %v153_v39 = vpop.xlane.xlu1 %152 }
 0x122   :  { %v155_v40 = vmul.f32 0.015625, %v153_v39 }
 0x124   :  { %v159_v41 = vsub.f32 %v155_v40, %v157_v38 }
 0x126   :  { %v571_v42 = vpop.eup %570  ;;  %v163_v43 = vadd.f32 1e-05, %v159_v41 }
 0x127   :  { %v165_v44 = vmul.f32 %v571_v42, %v162_v37  ;;  %vm171_vm1 = vweird.f32 %v571_v42 }
 0x128   :  { %572 = vrsqrt.f32 %v163_v43  ;;  %vm172_vm3 = vmor %vm170_vm2, %vm171_vm1  ;;  %vm180_vm5 = vweird.f32 %v163_v43 }
 0x129   :  { %v166_v45 = vmul.f32 %v571_v42, %v165_v44 }
 0x12b   :  { %v167_v46 = vmul.f32 0.5, %v166_v45 }
 0x12d   :  { %v168_v47 = vsub.f32 1.5, %v167_v46 }
 0x12e   :  { %v573_v48 = vpop.eup %572 }
 0x12f   :  { %v175_v49 = vmul.f32 %v573_v48, %v163_v43  ;;  %v169_v50 = vmul.f32 %v571_v42, %v168_v47  ;;  %vm181_vm4 = vweird.f32 %v573_v48 }
 0x130   :  { %vm182_vm6 = vmor %vm180_vm5, %vm181_vm4 }
 0x131   :  { %v176_v53 = vmul.f32 %v573_v48, %v175_v49  ;;  %v173_v54 = vsel %vm172_vm3, %v571_v42, %v169_v50 }
 0x132   :  { %v184_v55 = vmul.f32 %v173_v54, %v160_v51  ;;  %v561_v54 = vld [vmem:[#allocation8 + $0x4] ss:$0 sm:$0xff] }
 0x133   :  { %v177_v57 = vmul.f32 0.5, %v176_v53 }
 0x134   :  { %v187_v58 = vmul.f32 %v558_v52, %v184_v55 }
 0x135   :  { %v178_v59 = vsub.f32 1.5, %v177_v57 }
 0x136   :  { %v190_v60 = vadd.f32 %v559_v56, %v187_v58 }
 0x137   :  { %v179_v61 = vmul.f32 %v573_v48, %v178_v59  ;;  %v562_v59 = vld [vmem:[#allocation8 + $0x5] ss:$0 sm:$0xff] }
 0x138   :  { %v192_v63 = vmax.f32 %v190_v60, 0.0 }
 0x139   :  { %v183_v0 = vsel %vm182_vm6, %v573_v48, %v179_v61 }
 0x13a   :  { %230 = vmatmul.f32.vlgmr.msra.gmra.mxu1 %v192_v63  ;;  %v185_v1 = vmul.f32 %v183_v0, %v161_v62 }
 0x13c   :  { %v188_v2 = vmul.f32 %v558_v52, %v185_v1 }
 0x13e   :  { %v191_v3 = vadd.f32 %v559_v56, %v188_v2 }
 0x140   :  { %v193_v4 = vmax.f32 %v191_v3, 0.0 }
 0x142   :  { %233 = vmatmul.f32.gmra.mxu1 %v193_v4  ;;  %v563_v4 = vld [vmem:[#allocation8 + $0x6] ss:$0 sm:$0xff] }
 0x1b7   :  { %v231_v6 = vpop.f32.mrf.mxu1 }
 0x1b8   :  { %v823_v7 = vadd.f32 %v560_v5, %v231_v6 }
 0x1ba   :  { %237 = vadd.xlane.f32.xlu2 %v823_v7  ;;  %v243_v10 = vmul.f32 %v823_v7, %v823_v7 }
 0x1bf   :  { %v234_v8 = vpop.f32.mrf.mxu1 }
 0x1c0   :  { %v826_v9 = vadd.f32 %v560_v5, %v234_v8 }
 0x1c2   :  { %239 = vadd.xlane.f32.xlu0 %v826_v9  ;;  %245 = vadd.xlane.f32.xlu2 %v243_v10  ;;  %v244_v11 = vmul.f32 %v826_v9, %v826_v9 }
 0x1c4   :  { %247 = vadd.xlane.f32.xlu1 %v244_v11  ;;  %v401_v11 = vld [vmem:[#allocation7 + $0x178] sm:$0xff] }
 0x1c5   :  { %406 = vmatpush.msra.mxu3 %v401_v11  ;;  %v495_v11 = vld [vmem:[#allocation10 + $0x70] sm:$0xff] }
 0x1c7   :  { %407 = vmatpush.msra.mxu3 %v400_v12  ;;  %v494_v12 = vld [vmem:[#allocation10 + $0x68] sm:$0xff] }
 0x1c9   :  { %408 = vmatpush.msra.mxu3 %v399_v13  ;;  %v493_v13 = vld [vmem:[#allocation10 + $0x60] sm:$0xff] }
 0x1cb   :  { %409 = vmatpush.msra.mxu3 %v398_v14  ;;  %v492_v14 = vld [vmem:[#allocation10 + $0x58] sm:$0xff] }
 0x1cd   :  { %410 = vmatpush.msra.mxu3 %v397_v15  ;;  %v491_v15 = vld [vmem:[#allocation10 + $0x50] sm:$0xff] }
 0x1cf   :  { %411 = vmatpush.msra.mxu3 %v396_v16  ;;  %v490_v16 = vld [vmem:[#allocation10 + $0x48] sm:$0xff] }
 0x1d1   :  { %412 = vmatpush.msra.mxu3 %v395_v17  ;;  %v489_v17 = vld [vmem:[#allocation10 + $0x40] sm:$0xff] }
 0x1d3   :  { %413 = vmatpush.msra.mxu3 %v394_v18  ;;  %v488_v18 = vld [vmem:[#allocation10 + $0x38] sm:$0xff] }
 0x1d5   :  { %414 = vmatpush.msra.mxu3 %v393_v19  ;;  %v487_v19 = vld [vmem:[#allocation10 + $0x30] sm:$0xff] }
 0x1d7   :  { %415 = vmatpush.msra.mxu3 %v392_v20  ;;  %v486_v20 = vld [vmem:[#allocation10 + $0x28] sm:$0xff] }
 0x1d9   :  { %416 = vmatpush.msra.mxu3 %v391_v21  ;;  %v485_v21 = vld [vmem:[#allocation10 + $0x20] sm:$0xff] }
 0x1db   :  { %417 = vmatpush.msra.mxu3 %v390_v22  ;;  %v484_v22 = vld [vmem:[#allocation10 + $0x18] sm:$0xff] }
 0x1dd   :  { %418 = vmatpush.msra.mxu3 %v389_v23  ;;  %v483_v23 = vld [vmem:[#allocation10 + $0x10] sm:$0xff] }
 0x1df   :  { %419 = vmatpush.msra.mxu3 %v388_v24  ;;  %v482_v24 = vld [vmem:[#allocation10 + $0x8] sm:$0xff] }
 0x22d   :  { %v238_v25 = vpop.xlane.xlu2 %237 }
 0x22e   :  { %v241_v28 = vmul.f32 0.015625, %v238_v25  ;;  %v387_v25 = vld [vmem:[#allocation7 + $0x108] sm:$0xff] }
 0x22f   :  { %420 = vmatpush.msra.mxu3 %v387_v25  ;;  %v481_v25 = vld [vmem:[#allocation10] sm:$0xff] }
 0x230   :  { %v251_v32 = vmul.f32 %v241_v28, %v241_v28  ;;  %v255_v53 = vsub.f32 %v823_v7, %v241_v28 }
 0x231   :  { %421 = vmatpush.msra.mxu3 %v386_v26 }
 0x235   :  { %v240_v30 = vpop.xlane.xlu0 %239  ;;  %v246_v31 = vpop.xlane.xlu2 %245 }
 0x236   :  { %v242_v33 = vmul.f32 0.015625, %v240_v30  ;;  %v249_v34 = vmul.f32 0.015625, %v246_v31 }
 0x237   :  { %v248_v35 = vpop.xlane.xlu1 %247 }
 0x238   :  { %v252_v36 = vmul.f32 %v242_v33, %v242_v33  ;;  %v253_v37 = vsub.f32 %v249_v34, %v251_v32  ;;  %v250_v38 = vmul.f32 0.015625, %v248_v35  ;;  %v256_v57 = vsub.f32 %v826_v9, %v242_v33 }
 0x23a   :  { %v257_v39 = vadd.f32 1e-05, %v253_v37  ;;  %v254_v40 = vsub.f32 %v250_v38, %v252_v36 }
 0x23c   :  { %574 = vrsqrt.f32 %v257_v39  ;;  %v258_v41 = vadd.f32 1e-05, %v254_v40  ;;  %vm265_vm8 = vweird.f32 %v257_v39 }
 0x23e   :  { %576 = vrsqrt.f32 %v258_v41  ;;  %vm275_vm11 = vweird.f32 %v258_v41 }
 0x242   :  { %v575_v42 = vpop.eup %574 }
 0x243   :  { %v260_v43 = vmul.f32 %v575_v42, %v257_v39  ;;  %vm266_vm7 = vweird.f32 %v575_v42 }
 0x244   :  { %v577_v44 = vpop.eup %576  ;;  %vm267_vm10 = vmor %vm265_vm8, %vm266_vm7 }
 0x245   :  { %v261_v45 = vmul.f32 %v575_v42, %v260_v43  ;;  %v270_v46 = vmul.f32 %v577_v44, %v258_v41  ;;  %vm276_vm9 = vweird.f32 %v577_v44 }
 0x246   :  { %vm277_vm12 = vmor %vm275_vm11, %vm276_vm9 }
 0x247   :  { %v262_v47 = vmul.f32 0.5, %v261_v45  ;;  %v271_v48 = vmul.f32 %v577_v44, %v270_v46 }
 0x249   :  { %v263_v49 = vsub.f32 1.5, %v262_v47  ;;  %v272_v50 = vmul.f32 0.5, %v271_v48 }
 0x24b   :  { %v273_v51 = vsub.f32 1.5, %v272_v50  ;;  %v264_v52 = vmul.f32 %v575_v42, %v263_v49  ;;  %v564_v50 = vld [vmem:[#allocation8 + $0x7] ss:$0 sm:$0xff] }
 0x24d   :  { %v268_v55 = vsel %vm267_vm10, %v575_v42, %v264_v52  ;;  %v274_v56 = vmul.f32 %v577_v44, %v273_v51 }
 0x24e   :  { %v279_v58 = vmul.f32 %v268_v55, %v255_v53 }
 0x24f   :  { %v278_v60 = vsel %vm277_vm12, %v577_v44, %v274_v56 }
 0x250   :  { %v282_v61 = vmul.f32 %v561_v54, %v279_v58  ;;  %v280_v62 = vmul.f32 %v278_v60, %v256_v57 }
 0x252   :  { %v285_v63 = vadd.f32 %v562_v59, %v282_v61  ;;  %v283_v1 = vmul.f32 %v561_v54, %v280_v62  ;;  %v565_v54 = vld [vmem:[#allocation8 + $0x8] ss:$0 sm:$0xff] }
 0x254   :  { %v287_v0 = vmax.f32 %v285_v63, 0.0  ;;  %v286_v2 = vadd.f32 %v562_v59, %v283_v1 }
 0x256   :  { %326 = vmatmul.f32.vlgmr.msra.gmra.mxu2 %v287_v0  ;;  %v288_v3 = vmax.f32 %v286_v2, 0.0 }
 0x25e   :  { %329 = vmatmul.f32.gmra.mxu2 %v288_v3  ;;  %v566_v3 = vld [vmem:[#allocation8 + $0x9] ss:$0 sm:$0xff] }
 0x2d9   :  { %v327_v5 = vpop.f32.mrf.mxu2 }
 0x2da   :  { %v835_v6 = vadd.f32 %v563_v4, %v327_v5 }
 0x2dc   :  { %333 = vadd.xlane.f32.xlu2 %v835_v6  ;;  %v339_v7 = vmul.f32 %v835_v6, %v835_v6 }
 0x2de   :  { %341 = vadd.xlane.f32.xlu0 %v339_v7 }
 0x2e1   :  { %v330_v8 = vpop.f32.mrf.mxu2 }
 0x2e2   :  { %v840_v9 = vadd.f32 %v563_v4, %v330_v8 }
 0x2e4   :  { %335 = vadd.xlane.f32.xlu1 %v840_v9  ;;  %v340_v10 = vmul.f32 %v840_v9, %v840_v9 }
 0x2e6   :  { %343 = vadd.xlane.f32.xlu2 %v340_v10  ;;  %v496_v10 = vld [vmem:[#allocation10 + $0x78] sm:$0xff] }
 0x2e7   :  { %501 = vmatpush.msrb.mxu0 %v496_v10 }
 0x2e9   :  { %502 = vmatpush.msrb.mxu0 %v495_v11 }
 0x2eb   :  { %503 = vmatpush.msrb.mxu0 %v494_v12 }
 0x2ed   :  { %504 = vmatpush.msrb.mxu0 %v493_v13 }
 0x2ef   :  { %505 = vmatpush.msrb.mxu0 %v492_v14 }
 0x2f1   :  { %506 = vmatpush.msrb.mxu0 %v491_v15 }
 0x2f3   :  { %507 = vmatpush.msrb.mxu0 %v490_v16 }
 0x2f5   :  { %508 = vmatpush.msrb.mxu0 %v489_v17 }
 0x2f7   :  { %509 = vmatpush.msrb.mxu0 %v488_v18 }
 0x2f9   :  { %510 = vmatpush.msrb.mxu0 %v487_v19 }
 0x2fb   :  { %511 = vmatpush.msrb.mxu0 %v486_v20 }
 0x2fd   :  { %512 = vmatpush.msrb.mxu0 %v485_v21 }
 0x2ff   :  { %513 = vmatpush.msrb.mxu0 %v484_v22 }
 0x301   :  { %514 = vmatpush.msrb.mxu0 %v483_v23 }
 0x303   :  { %515 = vmatpush.msrb.mxu0 %v482_v24 }
 0x305   :  { %516 = vmatpush.msrb.mxu0 %v481_v25 }
 0x34f   :  { %v334_v27 = vpop.xlane.xlu2 %333 }
 0x350   :  { %v337_v28 = vmul.f32 0.015625, %v334_v27 }
 0x351   :  { %v342_v29 = vpop.xlane.xlu0 %341 }
 0x352   :  { %v347_v30 = vmul.f32 %v337_v28, %v337_v28  ;;  %v345_v31 = vmul.f32 0.015625, %v342_v29  ;;  %v351_v49 = vsub.f32 %v835_v6, %v337_v28 }
 0x354   :  { %v349_v32 = vsub.f32 %v345_v31, %v347_v30 }
 0x356   :  { %v353_v33 = vadd.f32 1e-05, %v349_v32 }
 0x357   :  { %v336_v34 = vpop.xlane.xlu1 %335 }
 0x358   :  { %578 = vrsqrt.f32 %v353_v33  ;;  %v338_v35 = vmul.f32 0.015625, %v336_v34  ;;  %vm361_vm14 = vweird.f32 %v353_v33 }
 0x359   :  { %v344_v36 = vpop.xlane.xlu2 %343 }
 0x35a   :  { %v348_v37 = vmul.f32 %v338_v35, %v338_v35  ;;  %v346_v38 = vmul.f32 0.015625, %v344_v36  ;;  %v352_v60 = vsub.f32 %v840_v9, %v338_v35 }
 0x35c   :  { %v350_v39 = vsub.f32 %v346_v38, %v348_v37 }
 0x35e   :  { %v579_v40 = vpop.eup %578  ;;  %v354_v41 = vadd.f32 1e-05, %v350_v39 }
 0x35f   :  { %v356_v42 = vmul.f32 %v579_v40, %v353_v33  ;;  %vm362_vm13 = vweird.f32 %v579_v40 }
 0x360   :  { %580 = vrsqrt.f32 %v354_v41  ;;  %vm363_vm15 = vmor %vm361_vm14, %vm362_vm13  ;;  %vm371_vm1 = vweird.f32 %v354_v41 }
 0x361   :  { %v357_v43 = vmul.f32 %v579_v40, %v356_v42 }
 0x363   :  { %v358_v44 = vmul.f32 0.5, %v357_v43 }
 0x365   :  { %v359_v45 = vsub.f32 1.5, %v358_v44 }
 0x366   :  { %v581_v46 = vpop.eup %580 }
 0x367   :  { %v366_v47 = vmul.f32 %v581_v46, %v354_v41  ;;  %v360_v48 = vmul.f32 %v579_v40, %v359_v45  ;;  %vm372_vm0 = vweird.f32 %v581_v46 }
 0x368   :  { %vm373_vm2 = vmor %vm371_vm1, %vm372_vm0 }
 0x369   :  { %v367_v51 = vmul.f32 %v581_v46, %v366_v47  ;;  %v364_v52 = vsel %vm363_vm15, %v579_v40, %v360_v48 }
 0x36a   :  { %v375_v53 = vmul.f32 %v364_v52, %v351_v49  ;;  %v567_v49 = vld [vmem:[#allocation8 + $0xa] ss:$0 sm:$0xff] }
 0x36b   :  { %v368_v55 = vmul.f32 0.5, %v367_v51 }
 0x36c   :  { %v378_v56 = vmul.f32 %v564_v50, %v375_v53  ;;  %v568_v53 = vld [vmem:[#allocation8 + $0xb] ss:$0 sm:$0xff] }
 0x36d   :  { %v369_v57 = vsub.f32 1.5, %v368_v55 }
 0x36e   :  { %v381_v58 = vadd.f32 %v565_v54, %v378_v56 }
 0x36f   :  { %v370_v59 = vmul.f32 %v581_v46, %v369_v57 }
 0x370   :  { %v383_v61 = vmax.f32 %v381_v58, 0.0 }
 0x371   :  { %v374_v62 = vsel %vm373_vm2, %v581_v46, %v370_v59 }
 0x372   :  { %422 = vmatmul.f32.vlgmr.msra.gmra.mxu3 %v383_v61  ;;  %v376_v63 = vmul.f32 %v374_v62, %v352_v60 }
 0x374   :  { %v379_v0 = vmul.f32 %v564_v50, %v376_v63 }
 0x376   :  { %v382_v1 = vadd.f32 %v565_v54, %v379_v0 }
 0x378   :  { %v384_v2 = vmax.f32 %v382_v1, 0.0 }
 0x37a   :  { %425 = vmatmul.f32.gmra.mxu3 %v384_v2  ;;  %v569_v2 = vld [vmem:[%s873_s5] ss:$0 sm:$0xff] }
 0x3f5   :  { %v423_v4 = vpop.f32.mrf.mxu3 }
 0x3f6   :  { %v847_v5 = vadd.f32 %v566_v3, %v423_v4 }
 0x3f8   :  { %429 = vadd.xlane.f32.xlu0 %v847_v5  ;;  %v435_v6 = vmul.f32 %v847_v5, %v847_v5 }
 0x3fa   :  { %437 = vadd.xlane.f32.xlu1 %v435_v6 }
 0x3fd   :  { %v426_v7 = vpop.f32.mrf.mxu3 }
 0x3fe   :  { %v852_v8 = vadd.f32 %v566_v3, %v426_v7 }
 0x400   :  { %431 = vadd.xlane.f32.xlu2 %v852_v8  ;;  %v436_v9 = vmul.f32 %v852_v8, %v852_v8 }
 0x402   :  { %439 = vadd.xlane.f32.xlu0 %v436_v9 }
 0x46b   :  { %v430_v26 = vpop.xlane.xlu0 %429 }
 0x46c   :  { %v433_v27 = vmul.f32 0.015625, %v430_v26 }
 0x46d   :  { %v438_v28 = vpop.xlane.xlu1 %437 }
 0x46e   :  { %v443_v29 = vmul.f32 %v433_v27, %v433_v27  ;;  %v441_v30 = vmul.f32 0.015625, %v438_v28  ;;  %v447_v48 = vsub.f32 %v847_v5, %v433_v27 }
 0x470   :  { %v445_v31 = vsub.f32 %v441_v30, %v443_v29 }
 0x472   :  { %v449_v32 = vadd.f32 1e-05, %v445_v31 }
 0x473   :  { %v432_v33 = vpop.xlane.xlu2 %431 }
 0x474   :  { %582 = vrsqrt.f32 %v449_v32  ;;  %v434_v34 = vmul.f32 0.015625, %v432_v33  ;;  %vm457_vm4 = vweird.f32 %v449_v32 }
 0x475   :  { %v440_v35 = vpop.xlane.xlu0 %439 }
 0x476   :  { %v444_v36 = vmul.f32 %v434_v34, %v434_v34  ;;  %v442_v37 = vmul.f32 0.015625, %v440_v35  ;;  %v448_v59 = vsub.f32 %v852_v8, %v434_v34 }
 0x478   :  { %v446_v38 = vsub.f32 %v442_v37, %v444_v36 }
 0x47a   :  { %v583_v39 = vpop.eup %582  ;;  %v450_v40 = vadd.f32 1e-05, %v446_v38 }
 0x47b   :  { %v452_v41 = vmul.f32 %v583_v39, %v449_v32  ;;  %vm458_vm3 = vweird.f32 %v583_v39 }
 0x47c   :  { %584 = vrsqrt.f32 %v450_v40  ;;  %vm459_vm5 = vmor %vm457_vm4, %vm458_vm3  ;;  %vm467_vm7 = vweird.f32 %v450_v40 }
 0x47d   :  { %v453_v42 = vmul.f32 %v583_v39, %v452_v41 }
 0x47f   :  { %v454_v43 = vmul.f32 0.5, %v453_v42 }
 0x481   :  { %v455_v44 = vsub.f32 1.5, %v454_v43 }
 0x482   :  { %v585_v45 = vpop.eup %584 }
 0x483   :  { %v456_v46 = vmul.f32 %v583_v39, %v455_v44  ;;  %v462_v47 = vmul.f32 %v585_v45, %v450_v40  ;;  %vm468_vm6 = vweird.f32 %v585_v45 }
 0x484   :  { %vm469_vm8 = vmor %vm467_vm7, %vm468_vm6 }
 0x485   :  { %v463_v50 = vmul.f32 %v585_v45, %v462_v47  ;;  %v460_v51 = vsel %vm459_vm5, %v583_v39, %v456_v46 }
 0x486   :  { %v471_v52 = vmul.f32 %v460_v51, %v447_v48 }
 0x487   :  { %v464_v54 = vmul.f32 0.5, %v463_v50 }
 0x488   :  { %v474_v55 = vmul.f32 %v567_v49, %v471_v52 }
 0x489   :  { %v465_v56 = vsub.f32 1.5, %v464_v54 }
 0x48a   :  { %v477_v57 = vadd.f32 %v568_v53, %v474_v55 }
 0x48b   :  { %v466_v58 = vmul.f32 %v585_v45, %v465_v56 }
 0x48c   :  { %v479_v60 = vmax.f32 %v477_v57, 0.0 }
 0x48d   :  { %v470_v61 = vsel %vm469_vm8, %v585_v45, %v466_v58 }
 0x48e   :  { %517 = vmatmul.f32.vlgmr.msrb.gmra.mxu0 %v479_v60  ;;  %v472_v62 = vmul.f32 %v470_v61, %v448_v59 }
 0x490   :  { %v475_v63 = vmul.f32 %v567_v49, %v472_v62 }
 0x492   :  { %v478_v0 = vadd.f32 %v568_v53, %v475_v63 }
 0x494   :  { %v480_v1 = vmax.f32 %v478_v0, 0.0 }
 0x496   :  { %520 = vmatmul.f32.gmra.mxu0 %v480_v1 }
 0x50b   :  { %v518_v3 = vpop.f32.mrf.mxu0 }
 0x50c   :  { %v519_v4 = vadd.f32 %v569_v2, %v518_v3 }
 0x50e   :  { %524 = vst [vmem:[#allocation11] sm:$0xff] %v519_v4 }
 0x513   :  { %v521_v5 = vpop.f32.mrf.mxu0 }
 0x514   :  { %v522_v6 = vadd.f32 %v569_v2, %v521_v5 }
 0x516   :  { %525 = vst [vmem:[#allocation11 + $0x8] sm:$0xff] %v522_v6 }
 0x517   :  { %538 = dma.vmem_to_hbm [thread:$0]  %s531_s22, 256, %s533_s25, [#allocation4], %s739_s29, %s739_s29, %s740_s30  }
 0x518   :  { %736 = dma.done.wait [#allocation4], 256  }
 0x519   :  { %737 = vsyncadd [#allocation4], 4294967040 }
 0x51a   :  { %543 = vsyncpa [#allocation3], 1 }
 0x51b   :  { %544 = vsyncpa [#allocation6], 1 }
 0x51c   :  { %545 = vsyncpa [#allocation9], 1 }
 0x51d   :  { %546 = vsyncpa [#allocation4], 1 }

</bundles_post_ra>
